<compile_context>
chip_gen: v6e
topology: v6e:2x2x1
jax: 0.10.0
libtpu: 0.0.40
codegen_flags: <defaults>
</compile_context>

<pallas_src>
import math
import functools

import jax
import jax.numpy as jnp
from jax.experimental import pallas as pl
from jax.experimental.pallas import tpu as pltpu

F32 = jnp.float32
BF16 = jnp.bfloat16


# --------------------------------------------------------------------------
# small helpers
# --------------------------------------------------------------------------
def _round_up(x, m):
    return ((x + m - 1) // m) * m


def _layer_norm(x, g, b, eps=1e-5):
    mu = jnp.mean(x, axis=-1, keepdims=True)
    var = jnp.mean((x - mu) ** 2, axis=-1, keepdims=True)
    return (x - mu) * jax.lax.rsqrt(var + eps) * g + b


def _full_spec(arr):
    # whole-array block, same block index every grid step -> fetched once.
    return pl.BlockSpec(arr.shape, lambda i, _r=arr.ndim: (0,) * _r)


# --------------------------------------------------------------------------
# Kernel 1: Fourier embedding
#   continuous_inputs [N, F] (+ optional categorical emb [N, H]) -> [N, H]
# --------------------------------------------------------------------------
def fourier_embed_kernel(num_freq_bands, has_cat, *refs):
    if has_cat:
        (cont_ref, cat_ref, freqs_ref, w1_ref, b1_ref, g1_ref, e1_ref,
         w2_ref, b2_ref, go_ref, bo_ref, wo_ref, bo2_ref, out_ref) = refs
    else:
        (cont_ref, freqs_ref, w1_ref, b1_ref, g1_ref, e1_ref,
         w2_ref, b2_ref, go_ref, bo_ref, wo_ref, bo2_ref, out_ref) = refs
        cat_ref = None

    cont = cont_ref[...]                                   # [tile, F] f32
    _, f = cont.shape
    two_pi = 2.0 * math.pi

    hs = []
    for i in range(f):                                     # static loop over features
        xi = cont[:, i:i + 1]                              # [tile, 1]
        ang = xi * (freqs_ref[i][None, :] * two_pi)        # [tile, B]
        feat = jnp.concatenate([jnp.cos(ang), jnp.sin(ang), xi], axis=-1)  # [tile, 2B+1]
        h = jnp.dot(feat.astype(BF16), w1_ref[i],
                    preferred_element_type=F32) + b1_ref[i][None, :]
        h = _layer_norm(h, g1_ref[i][None, :], e1_ref[i][None, :])
        hs.append(jnp.maximum(h, 0.0))

    # fused second linear: one K = F*H matmul instead of F small K = H matmuls
    h_all = jnp.concatenate(hs, axis=-1).astype(BF16)      # [tile, F*H]
    acc = jnp.dot(h_all, w2_ref[...], preferred_element_type=F32) + b2_ref[...]
    if has_cat:
        acc = acc + cat_ref[...]

    y = jnp.maximum(_layer_norm(acc, go_ref[...], bo_ref[...]), 0.0)
    out_ref[...] = jnp.dot(y.astype(BF16), wo_ref[...],
                           preferred_element_type=F32) + bo2_ref[...]


def fourier_embed(cont, p, num_freq_bands, cat_emb=None, row_tile=128):
    n, f = cont.shape
    hidden = p["wo"].shape[-1]
    tile = min(row_tile, _round_up(n, 8))
    n_pad = _round_up(n, tile)
    contp = jnp.pad(cont, ((0, n_pad - n), (0, 0)))

    args = [contp]
    specs = [pl.BlockSpec((tile, f), lambda i: (i, 0))]
    if cat_emb is not None:
        args.append(jnp.pad(cat_emb, ((0, n_pad - n), (0, 0))))
        specs.append(pl.BlockSpec((tile, hidden), lambda i: (i, 0)))
    for name in ("freqs", "w1", "b1", "g1", "e1", "w2f", "b2s",
                 "go", "bo", "wo", "bo2"):
        a = p[name]
        args.append(a)
        specs.append(_full_spec(a))

    kernel = functools.partial(fourier_embed_kernel, num_freq_bands,
                               cat_emb is not None)
    out = pl.pallas_call(
        kernel,
        grid=(n_pad // tile,),
        out_shape=jax.ShapeDtypeStruct((n_pad, hidden), F32),
        in_specs=specs,
        out_specs=pl.BlockSpec((tile, hidden), lambda i: (i, 0)),
        compiler_params=pltpu.CompilerParams(
            dimension_semantics=("parallel",),
            vmem_limit_bytes=48 * 1024 * 1024),
    )(*args)
    return out[:n]


# --------------------------------------------------------------------------
# Kernel 2: Attention layer (pre-norm MHA w/ gated aggregation + FF block)
#   x_dst tile [TD, H], x_src [Ns, H] (resident), mask tile [TD, Ns] -> [TD, H]
# --------------------------------------------------------------------------
def attention_layer_kernel(num_heads, head_dim,
                           xd_ref, xs_ref, mask_ref,
                           gsrc_ref, bsrc_ref, gdst_ref, bdst_ref,
                           wq_ref, bq_ref, wk_ref, wv_ref, bv_ref,
                           ws_ref, bs_ref, wga_ref, wgx_ref, bg_ref,
                           wo_ref, bo_ref,
                           gff_ref, bff_ref, wf1_ref, bf1_ref, wf2_ref, bf2_ref,
                           out_ref):
    x_dst = xd_ref[...]                                    # [TD, H]  f32
    x_src = xs_ref[...]                                    # [Ns, H]  f32
    maskf = mask_ref[...].astype(F32)                      # [TD, Ns] (int8 {0,1} in HBM)

    xs = _layer_norm(x_src, gsrc_ref[...], bsrc_ref[...])
    xd = _layer_norm(x_dst, gdst_ref[...], bdst_ref[...])
    xs_b = xs.astype(BF16)
    xd_b = xd.astype(BF16)

    # fused multi-head projections (bf16 operands, f32 accumulation on MXU)
    q = jnp.dot(xd_b, wq_ref[...], preferred_element_type=F32) + bq_ref[...]
    k = jnp.dot(xs_b, wk_ref[...], preferred_element_type=F32)
    v = jnp.dot(xs_b, wv_ref[...], preferred_element_type=F32) + bv_ref[...]
    q = q * (1.0 / math.sqrt(head_dim))                    # fold softmax scale into q

    hd = head_dim
    q3 = jnp.stack([q[:, h * hd:(h + 1) * hd] for h in range(num_heads)],
                   axis=0).astype(BF16)                    # [nh, TD, hd]
    k3 = jnp.stack([k[:, h * hd:(h + 1) * hd] for h in range(num_heads)],
                   axis=0).astype(BF16)                    # [nh, Ns, hd]
    v3 = jnp.stack([v[:, h * hd:(h + 1) * hd] for h in range(num_heads)],
                   axis=0).astype(BF16)                    # [nh, Ns, hd]

    # batched (head-leading) attention, softmax statistics in f32
    scores = jnp.einsum('hqd,hkd->hqk', q3, k3, preferred_element_type=F32)
    scores = jnp.where(maskf[None] > 0, scores, jnp.float32(-1e30))
    m = jnp.max(scores, axis=-1, keepdims=True)
    p = jnp.exp(scores - m)                                # masked entries underflow to 0
    denom = jnp.sum(p, axis=-1, keepdims=True)             # >= 1 always
    p = p * pl.reciprocal(denom, approx=True)
    agg3 = jnp.einsum('hqk,hkd->hqd', p.astype(BF16), v3,
                      preferred_element_type=F32)          # [nh, TD, hd]
    agg = jnp.concatenate([agg3[h] for h in range(num_heads)], axis=-1)  # [TD, nh*hd]

    # rows with no incoming edge aggregate to zero (scatter-softmax semantics)
    valid = jnp.sum(maskf, axis=-1, keepdims=True) > 0
    agg = jnp.where(valid, agg, 0.0)

    # gated self-update:  out = agg + sigmoid(g) * (W_s x_dst - agg)
    agg_b = agg.astype(BF16)
    g = jax.nn.sigmoid(
        jnp.dot(agg_b, wga_ref[...], preferred_element_type=F32)
        + jnp.dot(xd_b, wgx_ref[...], preferred_element_type=F32)
        + bg_ref[...])
    s = jnp.dot(xd_b, ws_ref[...], preferred_element_type=F32) + bs_ref[...]
    msg = agg + g * (s - agg)
    attn_out = jnp.dot(msg.astype(BF16), wo_ref[...],
                       preferred_element_type=F32) + bo_ref[...]

    x = x_dst + attn_out                                   # residual 1

    xf = _layer_norm(x, gff_ref[...], bff_ref[...])
    h1 = jnp.maximum(
        jnp.dot(xf.astype(BF16), wf1_ref[...], preferred_element_type=F32)
        + bf1_ref[...], 0.0)
    ff = jnp.dot(h1.astype(BF16), wf2_ref[...], preferred_element_type=F32) + bf2_ref[...]
    out_ref[...] = x + ff                                  # residual 2


_ATTN_PARAM_ORDER = ("g_src", "b_src", "g_dst", "b_dst",
                     "wq", "bq", "wk", "wv", "bv",
                     "ws", "bs", "wg_a", "wg_x", "bg",
                     "wo", "bo",
                     "g_ff", "b_ff", "wf1", "bf1", "wf2", "bf2")


def attention_layer(x_dst, x_src, mask, p, num_heads, head_dim, row_tile=128):
    nd, hidden = x_dst.shape
    ns = x_src.shape[0]
    td = min(row_tile, _round_up(nd, 32))      # 32-row granule keeps int8/f32 tiling legal
    nd_pad = _round_up(nd, td)
    xd = jnp.pad(x_dst, ((0, nd_pad - nd), (0, 0)))
    mk = jnp.pad(mask, ((0, nd_pad - nd), (0, 0)))         # padded rows fully masked -> 0

    w_args = [p[name] for name in _ATTN_PARAM_ORDER]
    in_specs = ([pl.BlockSpec((td, hidden), lambda i: (i, 0)),   # x_dst tile
                 _full_spec(x_src),                              # x_src resident
                 pl.BlockSpec((td, ns), lambda i: (i, 0))]       # int8 mask tile
                + [_full_spec(a) for a in w_args])

    kernel = functools.partial(attention_layer_kernel, num_heads, head_dim)
    out = pl.pallas_call(
        kernel,
        grid=(nd_pad // td,),
        out_shape=jax.ShapeDtypeStruct((nd_pad, hidden), F32),
        in_specs=in_specs,
        out_specs=pl.BlockSpec((td, hidden), lambda i: (i, 0)),
        compiler_params=pltpu.CompilerParams(
            dimension_semantics=("parallel",),        # shard Nd tiles over TCs (v7x)
            vmem_limit_bytes=48 * 1024 * 1024),       # sized against v7x's 64 MiB
    )(xd, x_src, mk, *w_args)
    return out[:nd]


# --------------------------------------------------------------------------
# deterministic parameter init (matmul weights stored bf16)
# --------------------------------------------------------------------------
def _dense(key, fan_in, fan_out, dtype=F32):
    lim = 1.0 / math.sqrt(fan_in)
    return jax.random.uniform(key, (fan_in, fan_out), F32, -lim, lim).astype(dtype)


def init_fourier(key, input_dim, num_freq_bands, hidden_dim):
    keys = jax.random.split(key, 2 * input_dim + 2)
    it = iter(keys)
    fb = 2 * num_freq_bands + 1
    w1 = jnp.stack([_dense(next(it), fb, hidden_dim) for _ in range(input_dim)]).astype(BF16)
    w2 = jnp.stack([_dense(next(it), hidden_dim, hidden_dim) for _ in range(input_dim)])
    w2f = w2.reshape(input_dim * hidden_dim, hidden_dim).astype(BF16)
    freqs = jax.random.normal(next(it), (input_dim, num_freq_bands), F32)
    wo = _dense(next(it), hidden_dim, hidden_dim, BF16)
    z = lambda *s: jnp.zeros(s, F32)
    o = lambda *s: jnp.ones(s, F32)
    return dict(freqs=freqs,
                w1=w1, b1=z(input_dim, hidden_dim),
                g1=o(input_dim, hidden_dim), e1=z(input_dim, hidden_dim),
                w2f=w2f, b2s=z(1, hidden_dim),
                go=o(1, hidden_dim), bo=z(1, hidden_dim),
                wo=wo, bo2=z(1, hidden_dim))


def init_attention(key, hidden_dim, num_heads, head_dim):
    D = num_heads * head_dim
    keys = jax.random.split(key, 9)
    it = iter(keys)
    z = lambda *s: jnp.zeros(s, F32)
    o = lambda *s: jnp.ones(s, F32)
    return dict(
        g_src=o(1, hidden_dim), b_src=z(1, hidden_dim),
        g_dst=o(1, hidden_dim), b_dst=z(1, hidden_dim),
        wq=_dense(next(it), hidden_dim, D, BF16), bq=z(1, D),
        wk=_dense(next(it), hidden_dim, D, BF16),
        wv=_dense(next(it), hidden_dim, D, BF16), bv=z(1, D),
        ws=_dense(next(it), hidden_dim, D, BF16), bs=z(1, D),
        wg_a=_dense(next(it), D, D, BF16),
        wg_x=_dense(next(it), hidden_dim, D, BF16), bg=z(1, D),
        wo=_dense(next(it), D, hidden_dim, BF16), bo=z(1, hidden_dim),
        g_ff=o(1, hidden_dim), b_ff=z(1, hidden_dim),
        wf1=_dense(next(it), hidden_dim, 4 * hidden_dim, BF16), bf1=z(1, 4 * hidden_dim),
        wf2=_dense(next(it), 4 * hidden_dim, hidden_dim, BF16), bf2=z(1, hidden_dim),
    )


# --------------------------------------------------------------------------
# QCNetEncoder = QCNetMapEncoder + QCNetAgentEncoder
# --------------------------------------------------------------------------
def qcnet_map_encoder(params, cfg, pt_cont, pl_cont, pt2pl_mask, pl2pl_mask):
    nh, hd, B, T = (cfg["num_heads"], cfg["head_dim"],
                    cfg["num_freq_bands"], cfg["num_historical_steps"])
    x_pt = fourier_embed(pt_cont, params["pt_emb"], B)       # no categorical embedding
    x_pl = fourier_embed(pl_cont, params["pl_emb"], B)
    for layer in params["map_layers"]:
        x_pl = attention_layer(x_pl, x_pt, pt2pl_mask, layer["pt2pl"], nh, hd)
        x_pl = attention_layer(x_pl, x_pl, pl2pl_mask, layer["pl2pl"], nh, hd)
    # x_pl is broadcast across the historical time axis, as in QCNet
    x_pl_t = jnp.repeat(x_pl[:, None, :], T, axis=1)         # [Npl, T, H]
    return {"x_pt": x_pt, "x_pl": x_pl_t}


def qcnet_agent_encoder(params, cfg, a_cont, a_cat_emb, map_enc,
                        t2a_mask, pl2a_mask, a2a_mask, num_agents):
    H, nh, hd, B, T = (cfg["hidden_dim"], cfg["num_heads"], cfg["head_dim"],
                       cfg["num_freq_bands"], cfg["num_historical_steps"])
    x_a = fourier_embed(a_cont, params["a_emb"], B, cat_emb=a_cat_emb)   # [A*T, H]
    x_pl = map_enc["x_pl"][:, 0, :]                                       # [Npl, H]
    for layer in params["agent_layers"]:
        x_a = attention_layer(x_a, x_a, t2a_mask, layer["t2a"], nh, hd)
        x_a = attention_layer(x_a, x_pl, pl2a_mask, layer["pl2a"], nh, hd)
        x_a = attention_layer(x_a, x_a, a2a_mask, layer["a2a"], nh, hd)
    return {"x_a": x_a.reshape(num_agents, T, H)}


def qcnet_encoder(params, cfg, data):
    map_enc = qcnet_map_encoder(params, cfg, data["pt_cont"], data["pl_cont"],
                                data["pt2pl_mask"], data["pl2pl_mask"])
    agent_enc = qcnet_agent_encoder(params, cfg, data["a_cont"], data["a_cat_emb"],
                                    map_enc, data["t2a_mask"], data["pl2a_mask"],
                                    data["a2a_mask"], data["num_agents"])
    return {**map_enc, **agent_enc}


# --------------------------------------------------------------------------
# glue: dense int8 edge masks replacing radius_graph / HeteroData edge indices
# --------------------------------------------------------------------------
def build_masks(pl_pos, pt2pl_assign, a_pos, cfg):
    A, T = a_pos.shape[0], a_pos.shape[1]
    Npl = pl_pos.shape[0]
    i8 = jnp.int8
    # pt -> pl: membership (point belongs to polygon)
    pt2pl = (pt2pl_assign[None, :] == jnp.arange(Npl)[:, None]).astype(i8)
    # pl -> pl: within radius, no self loops
    d_pl = jnp.linalg.norm(pl_pos[:, None] - pl_pos[None, :], axis=-1)
    pl2pl = ((d_pl <= cfg["pl2pl_radius"]) & (~jnp.eye(Npl, dtype=bool))).astype(i8)
    # temporal (t -> a): same agent, strictly past, gap <= time_span
    idx = jnp.arange(A * T)
    ai, ti = idx // T, idx % T
    dt = ti[:, None] - ti[None, :]
    t2a = ((ai[:, None] == ai[None, :]) & (dt > 0) & (dt <= cfg["time_span"])).astype(i8)
    # pl -> a: polygon within pl2a_radius of agent position at that timestep
    a_flat = a_pos.reshape(A * T, 2)
    d_pla = jnp.linalg.norm(a_flat[:, None] - pl_pos[None, :], axis=-1)
    pl2a = (d_pla <= cfg["pl2a_radius"]).astype(i8)
    # a -> a: same timestep, different agent, within a2a_radius
    d_aa = jnp.linalg.norm(a_flat[:, None] - a_flat[None, :], axis=-1)
    a2a = ((ti[:, None] == ti[None, :]) & (ai[:, None] != ai[None, :])
           & (d_aa <= cfg["a2a_radius"])).astype(i8)
    return pt2pl, pl2pl, t2a, pl2a, a2a


# --------------------------------------------------------------------------
# main
# --------------------------------------------------------------------------
if __name__ == "__main__":
    cfg = dict(input_dim=2, hidden_dim=128, num_historical_steps=8,
               pl2pl_radius=150.0, time_span=4, pl2a_radius=50.0, a2a_radius=50.0,
               num_freq_bands=8, num_map_layers=1, num_agent_layers=1,
               num_heads=8, head_dim=16)

    num_pt, num_pl, num_agents = 16, 8, 4
    T, H = cfg["num_historical_steps"], cfg["hidden_dim"]
    F_map = cfg["input_dim"]          # continuous map features
    F_agent = cfg["input_dim"] + 2    # continuous agent motion features

    root = jax.random.PRNGKey(0)
    k = iter(jax.random.split(root, 32))

    # parameters (deterministic, synthetic)
    params = dict(
        pt_emb=init_fourier(next(k), F_map, cfg["num_freq_bands"], H),
        pl_emb=init_fourier(next(k), F_map, cfg["num_freq_bands"], H),
        a_emb=init_fourier(next(k), F_agent, cfg["num_freq_bands"], H),
        map_layers=[dict(pt2pl=init_attention(next(k), H, cfg["num_heads"], cfg["head_dim"]),
                         pl2pl=init_attention(next(k), H, cfg["num_heads"], cfg["head_dim"]))
                    for _ in range(cfg["num_map_layers"])],
        agent_layers=[dict(t2a=init_attention(next(k), H, cfg["num_heads"], cfg["head_dim"]),
                           pl2a=init_attention(next(k), H, cfg["num_heads"], cfg["head_dim"]),
                           a2a=init_attention(next(k), H, cfg["num_heads"], cfg["head_dim"]))
                      for _ in range(cfg["num_agent_layers"])],
        a_type_table=0.1 * jax.random.normal(next(k), (10, H), F32),
    )

    # synthetic inputs (stand-in for HeteroData)
    pt_cont = jax.random.normal(next(k), (num_pt, F_map), F32)
    pl_cont = jax.random.normal(next(k), (num_pl, F_map), F32)
    a_cont = jax.random.normal(next(k), (num_agents * T, F_agent), F32)
    pl_pos = 40.0 * jax.random.uniform(next(k), (num_pl, 2), F32)
    a_pos = 40.0 * jax.random.uniform(next(k), (num_agents, T, 2), F32)
    pt2pl_assign = jax.random.randint(next(k), (num_pt,), 0, num_pl)
    a_type = jax.random.randint(next(k), (num_agents,), 0, 10)
    a_cat_emb = jnp.repeat(params["a_type_table"][a_type], T, axis=0)  # [A*T, H]

    pt2pl_m, pl2pl_m, t2a_m, pl2a_m, a2a_m = build_masks(pl_pos, pt2pl_assign, a_pos, cfg)

    data = dict(pt_cont=pt_cont, pl_cont=pl_cont, a_cont=a_cont, a_cat_emb=a_cat_emb,
                pt2pl_mask=pt2pl_m, pl2pl_mask=pl2pl_m, t2a_mask=t2a_m,
                pl2a_mask=pl2a_m, a2a_mask=a2a_m, num_agents=num_agents)

    out = qcnet_encoder(params, cfg, data)
    jax.block_until_ready(out)

    assert out["x_pt"].shape == (num_pt, H)
    assert out["x_pl"].shape == (num_pl, T, H)
    assert out["x_a"].shape == (num_agents, T, H)
    assert all(bool(jnp.all(jnp.isfinite(v))) for v in out.values())
    print("KERNEL_OK")
</pallas_src>

<mosaic_0001>
module attributes {stable_mosaic.version = 11 : i64} {
  func.func @fourier_embed_kernel(%arg0: i32, %arg1: memref<16x2xf32, #tpu.memory_space<vmem>>, %arg2: memref<2x8xf32, #tpu.memory_space<vmem>>, %arg3: memref<2x17x128xbf16, #tpu.memory_space<vmem>>, %arg4: memref<2x128xf32, #tpu.memory_space<vmem>>, %arg5: memref<2x128xf32, #tpu.memory_space<vmem>>, %arg6: memref<2x128xf32, #tpu.memory_space<vmem>>, %arg7: memref<256x128xbf16, #tpu.memory_space<vmem>>, %arg8: memref<1x128xf32, #tpu.memory_space<vmem>>, %arg9: memref<1x128xf32, #tpu.memory_space<vmem>>, %arg10: memref<1x128xf32, #tpu.memory_space<vmem>>, %arg11: memref<128x128xbf16, #tpu.memory_space<vmem>>, %arg12: memref<1x128xf32, #tpu.memory_space<vmem>>, %arg13: memref<16x128xf32, #tpu.memory_space<vmem>>) attributes {dimension_semantics = [#tpu.dimension_semantics<parallel>], iteration_bounds = array<i64: 1>, scalar_prefetch = 0 : i64, scratch_operands = 0 : i64, tpu.core_type = #tpu.core_type<tc>, window_params = [{transform_indices = @transform_0, window_bounds = array<i64: 16, 2>}, {pipeline_mode = #tpu.pipeline_mode<synchronous>, transform_indices = @transform_1, window_bounds = array<i64: 2, 8>}, {pipeline_mode = #tpu.pipeline_mode<synchronous>, transform_indices = @transform_2, window_bounds = array<i64: 2, 17, 128>}, {pipeline_mode = #tpu.pipeline_mode<synchronous>, transform_indices = @transform_3, window_bounds = array<i64: 2, 128>}, {pipeline_mode = #tpu.pipeline_mode<synchronous>, transform_indices = @transform_4, window_bounds = array<i64: 2, 128>}, {pipeline_mode = #tpu.pipeline_mode<synchronous>, transform_indices = @transform_5, window_bounds = array<i64: 2, 128>}, {pipeline_mode = #tpu.pipeline_mode<synchronous>, transform_indices = @transform_6, window_bounds = array<i64: 256, 128>}, {pipeline_mode = #tpu.pipeline_mode<synchronous>, transform_indices = @transform_7, window_bounds = array<i64: 1, 128>}, {pipeline_mode = #tpu.pipeline_mode<synchronous>, transform_indices = @transform_8, window_bounds = array<i64: 1, 128>}, {pipeline_mode = #tpu.pipeline_mode<synchronous>, transform_indices = @transform_9, window_bounds = array<i64: 1, 128>}, {pipeline_mode = #tpu.pipeline_mode<synchronous>, transform_indices = @transform_10, window_bounds = array<i64: 128, 128>}, {pipeline_mode = #tpu.pipeline_mode<synchronous>, transform_indices = @transform_11, window_bounds = array<i64: 1, 128>}, {transform_indices = @transform_12, window_bounds = array<i64: 16, 128>}]} {
    %c0 = arith.constant 0 : index
    %c0_0 = arith.constant 0 : index
    %0 = vector.load %arg1[%c0, %c0_0] : memref<16x2xf32, #tpu.memory_space<vmem>>, vector<16x2xf32>
    %1 = vector.extract_strided_slice %0 {offsets = [0, 0], sizes = [16, 1], strides = [1, 1]} : vector<16x2xf32> to vector<16x1xf32>
    %c0_1 = arith.constant 0 : index
    %c0_2 = arith.constant 0 : index
    %2 = vector.load %arg2[%c0_1, %c0_2] : memref<2x8xf32, #tpu.memory_space<vmem>>, vector<1x8xf32>
    %3 = vector.shape_cast %2 : vector<1x8xf32> to vector<8xf32>
    %4 = vector.shape_cast %3 : vector<8xf32> to vector<1x8xf32>
    %cst = arith.constant 6.28318548 : f32
    %5 = vector.broadcast %cst : f32 to vector<1x8xf32>
    %6 = arith.mulf %4, %5 : vector<1x8xf32>
    %7 = vector.broadcast %1 : vector<16x1xf32> to vector<16x8xf32>
    %8 = vector.broadcast %6 : vector<1x8xf32> to vector<16x8xf32>
    %9 = arith.mulf %7, %8 : vector<16x8xf32>
    %10 = math.cos %9 : vector<16x8xf32>
    %11 = math.sin %9 : vector<16x8xf32>
    %12 = tpu.concatenate %10, %11, %1 in 1 : vector<16x8xf32>, vector<16x8xf32>, vector<16x1xf32> -> vector<16x17xf32>
    %13 = arith.truncf %12 : vector<16x17xf32> to vector<16x17xbf16>
    %c0_3 = arith.constant 0 : index
    %c0_4 = arith.constant 0 : index
    %c0_5 = arith.constant 0 : index
    %14 = vector.load %arg3[%c0_3, %c0_4, %c0_5] : memref<2x17x128xbf16, #tpu.memory_space<vmem>>, vector<1x17x128xbf16>
    %15 = vector.shape_cast %14 : vector<1x17x128xbf16> to vector<17x128xbf16>
    %cst_6 = arith.constant dense<0.000000e+00> : vector<16x128xf32>
    %16 = tpu.matmul %13, %15, %cst_6 {dimension_numbers = #tpu.dot_dimension_numbers<[1], [0], [0], [1], [0, 0, 1, 1], [], []>} : vector<16x17xbf16>, vector<17x128xbf16>, vector<16x128xf32> -> vector<16x128xf32>
    %c0_7 = arith.constant 0 : index
    %c0_8 = arith.constant 0 : index
    %17 = vector.load %arg4[%c0_7, %c0_8] : memref<2x128xf32, #tpu.memory_space<vmem>>, vector<1x128xf32>
    %18 = vector.shape_cast %17 : vector<1x128xf32> to vector<128xf32>
    %19 = vector.shape_cast %18 : vector<128xf32> to vector<1x128xf32>
    %20 = vector.broadcast %19 : vector<1x128xf32> to vector<16x128xf32>
    %21 = arith.addf %16, %20 : vector<16x128xf32>
    %c0_9 = arith.constant 0 : index
    %c0_10 = arith.constant 0 : index
    %22 = vector.load %arg5[%c0_9, %c0_10] : memref<2x128xf32, #tpu.memory_space<vmem>>, vector<1x128xf32>
    %23 = vector.shape_cast %22 : vector<1x128xf32> to vector<128xf32>
    %24 = vector.shape_cast %23 : vector<128xf32> to vector<1x128xf32>
    %c0_11 = arith.constant 0 : index
    %c0_12 = arith.constant 0 : index
    %25 = vector.load %arg6[%c0_11, %c0_12] : memref<2x128xf32, #tpu.memory_space<vmem>>, vector<1x128xf32>
    %26 = vector.shape_cast %25 : vector<1x128xf32> to vector<128xf32>
    %27 = vector.shape_cast %26 : vector<128xf32> to vector<1x128xf32>
    %cst_13 = arith.constant dense<0.000000e+00> : vector<16xf32>
    %28 = vector.multi_reduction <add>, %21, %cst_13 [1] : vector<16x128xf32> to vector<16xf32>
    %29 = vector.shape_cast %28 : vector<16xf32> to vector<16x1xf32>
    %cst_14 = arith.constant 1.280000e+02 : f32
    %30 = vector.broadcast %cst_14 : f32 to vector<16x1xf32>
    %31 = arith.divf %29, %30 : vector<16x1xf32>
    %32 = vector.broadcast %31 : vector<16x1xf32> to vector<16x128xf32>
    %33 = arith.subf %21, %32 : vector<16x128xf32>
    %34 = arith.mulf %33, %33 : vector<16x128xf32>
    %cst_15 = arith.constant dense<0.000000e+00> : vector<16xf32>
    %35 = vector.multi_reduction <add>, %34, %cst_15 [1] : vector<16x128xf32> to vector<16xf32>
    %36 = vector.shape_cast %35 : vector<16xf32> to vector<16x1xf32>
    %cst_16 = arith.constant 1.280000e+02 : f32
    %37 = vector.broadcast %cst_16 : f32 to vector<16x1xf32>
    %38 = arith.divf %36, %37 : vector<16x1xf32>
    %39 = vector.broadcast %31 : vector<16x1xf32> to vector<16x128xf32>
    %40 = arith.subf %21, %39 : vector<16x128xf32>
    %cst_17 = arith.constant 9.99999974E-6 : f32
    %41 = vector.broadcast %cst_17 : f32 to vector<16x1xf32>
    %42 = arith.addf %38, %41 : vector<16x1xf32>
    %43 = math.rsqrt %42 : vector<16x1xf32>
    %44 = vector.broadcast %43 : vector<16x1xf32> to vector<16x128xf32>
    %45 = arith.mulf %40, %44 : vector<16x128xf32>
    %46 = vector.broadcast %24 : vector<1x128xf32> to vector<16x128xf32>
    %47 = arith.mulf %45, %46 : vector<16x128xf32>
    %48 = vector.broadcast %27 : vector<1x128xf32> to vector<16x128xf32>
    %49 = arith.addf %47, %48 : vector<16x128xf32>
    %cst_18 = arith.constant 0.000000e+00 : f32
    %50 = vector.broadcast %cst_18 : f32 to vector<16x128xf32>
    %51 = arith.maximumf %49, %50 : vector<16x128xf32>
    %52 = vector.extract_strided_slice %0 {offsets = [0, 1], sizes = [16, 1], strides = [1, 1]} : vector<16x2xf32> to vector<16x1xf32>
    %c1 = arith.constant 1 : index
    %c0_19 = arith.constant 0 : index
    %53 = vector.load %arg2[%c1, %c0_19] : memref<2x8xf32, #tpu.memory_space<vmem>>, vector<1x8xf32>
    %54 = vector.shape_cast %53 : vector<1x8xf32> to vector<8xf32>
    %55 = vector.shape_cast %54 : vector<8xf32> to vector<1x8xf32>
    %cst_20 = arith.constant 6.28318548 : f32
    %56 = vector.broadcast %cst_20 : f32 to vector<1x8xf32>
    %57 = arith.mulf %55, %56 : vector<1x8xf32>
    %58 = vector.broadcast %52 : vector<16x1xf32> to vector<16x8xf32>
    %59 = vector.broadcast %57 : vector<1x8xf32> to vector<16x8xf32>
    %60 = arith.mulf %58, %59 : vector<16x8xf32>
    %61 = math.cos %60 : vector<16x8xf32>
    %62 = math.sin %60 : vector<16x8xf32>
    %63 = tpu.concatenate %61, %62, %52 in 1 : vector<16x8xf32>, vector<16x8xf32>, vector<16x1xf32> -> vector<16x17xf32>
    %64 = arith.truncf %63 : vector<16x17xf32> to vector<16x17xbf16>
    %c1_21 = arith.constant 1 : index
    %c0_22 = arith.constant 0 : index
    %c0_23 = arith.constant 0 : index
    %65 = vector.load %arg3[%c1_21, %c0_22, %c0_23] : memref<2x17x128xbf16, #tpu.memory_space<vmem>>, vector<1x17x128xbf16>
    %66 = vector.shape_cast %65 : vector<1x17x128xbf16> to vector<17x128xbf16>
    %cst_24 = arith.constant dense<0.000000e+00> : vector<16x128xf32>
    %67 = tpu.matmul %64, %66, %cst_24 {dimension_numbers = #tpu.dot_dimension_numbers<[1], [0], [0], [1], [0, 0, 1, 1], [], []>} : vector<16x17xbf16>, vector<17x128xbf16>, vector<16x128xf32> -> vector<16x128xf32>
    %c1_25 = arith.constant 1 : index
    %c0_26 = arith.constant 0 : index
    %68 = vector.load %arg4[%c1_25, %c0_26] : memref<2x128xf32, #tpu.memory_space<vmem>>, vector<1x128xf32>
    %69 = vector.shape_cast %68 : vector<1x128xf32> to vector<128xf32>
    %70 = vector.shape_cast %69 : vector<128xf32> to vector<1x128xf32>
    %71 = vector.broadcast %70 : vector<1x128xf32> to vector<16x128xf32>
    %72 = arith.addf %67, %71 : vector<16x128xf32>
    %c1_27 = arith.constant 1 : index
    %c0_28 = arith.constant 0 : index
    %73 = vector.load %arg5[%c1_27, %c0_28] : memref<2x128xf32, #tpu.memory_space<vmem>>, vector<1x128xf32>
    %74 = vector.shape_cast %73 : vector<1x128xf32> to vector<128xf32>
    %75 = vector.shape_cast %74 : vector<128xf32> to vector<1x128xf32>
    %c1_29 = arith.constant 1 : index
    %c0_30 = arith.constant 0 : index
    %76 = vector.load %arg6[%c1_29, %c0_30] : memref<2x128xf32, #tpu.memory_space<vmem>>, vector<1x128xf32>
    %77 = vector.shape_cast %76 : vector<1x128xf32> to vector<128xf32>
    %78 = vector.shape_cast %77 : vector<128xf32> to vector<1x128xf32>
    %cst_31 = arith.constant dense<0.000000e+00> : vector<16xf32>
    %79 = vector.multi_reduction <add>, %72, %cst_31 [1] : vector<16x128xf32> to vector<16xf32>
    %80 = vector.shape_cast %79 : vector<16xf32> to vector<16x1xf32>
    %cst_32 = arith.constant 1.280000e+02 : f32
    %81 = vector.broadcast %cst_32 : f32 to vector<16x1xf32>
    %82 = arith.divf %80, %81 : vector<16x1xf32>
    %83 = vector.broadcast %82 : vector<16x1xf32> to vector<16x128xf32>
    %84 = arith.subf %72, %83 : vector<16x128xf32>
    %85 = arith.mulf %84, %84 : vector<16x128xf32>
    %cst_33 = arith.constant dense<0.000000e+00> : vector<16xf32>
    %86 = vector.multi_reduction <add>, %85, %cst_33 [1] : vector<16x128xf32> to vector<16xf32>
    %87 = vector.shape_cast %86 : vector<16xf32> to vector<16x1xf32>
    %cst_34 = arith.constant 1.280000e+02 : f32
    %88 = vector.broadcast %cst_34 : f32 to vector<16x1xf32>
    %89 = arith.divf %87, %88 : vector<16x1xf32>
    %90 = vector.broadcast %82 : vector<16x1xf32> to vector<16x128xf32>
    %91 = arith.subf %72, %90 : vector<16x128xf32>
    %cst_35 = arith.constant 9.99999974E-6 : f32
    %92 = vector.broadcast %cst_35 : f32 to vector<16x1xf32>
    %93 = arith.addf %89, %92 : vector<16x1xf32>
    %94 = math.rsqrt %93 : vector<16x1xf32>
    %95 = vector.broadcast %94 : vector<16x1xf32> to vector<16x128xf32>
    %96 = arith.mulf %91, %95 : vector<16x128xf32>
    %97 = vector.broadcast %75 : vector<1x128xf32> to vector<16x128xf32>
    %98 = arith.mulf %96, %97 : vector<16x128xf32>
    %99 = vector.broadcast %78 : vector<1x128xf32> to vector<16x128xf32>
    %100 = arith.addf %98, %99 : vector<16x128xf32>
    %cst_36 = arith.constant 0.000000e+00 : f32
    %101 = vector.broadcast %cst_36 : f32 to vector<16x128xf32>
    %102 = arith.maximumf %100, %101 : vector<16x128xf32>
    %103 = tpu.concatenate %51, %102 in 1 : vector<16x128xf32>, vector<16x128xf32> -> vector<16x256xf32>
    %104 = arith.truncf %103 : vector<16x256xf32> to vector<16x256xbf16>
    %c0_37 = arith.constant 0 : index
    %c0_38 = arith.constant 0 : index
    %105 = vector.load %arg7[%c0_37, %c0_38] : memref<256x128xbf16, #tpu.memory_space<vmem>>, vector<256x128xbf16>
    %cst_39 = arith.constant dense<0.000000e+00> : vector<16x128xf32>
    %106 = tpu.matmul %104, %105, %cst_39 {dimension_numbers = #tpu.dot_dimension_numbers<[1], [0], [0], [1], [0, 0, 1, 1], [], []>} : vector<16x256xbf16>, vector<256x128xbf16>, vector<16x128xf32> -> vector<16x128xf32>
    %c0_40 = arith.constant 0 : index
    %c0_41 = arith.constant 0 : index
    %107 = vector.load %arg8[%c0_40, %c0_41] : memref<1x128xf32, #tpu.memory_space<vmem>>, vector<1x128xf32>
    %108 = vector.broadcast %107 : vector<1x128xf32> to vector<16x128xf32>
    %109 = arith.addf %106, %108 : vector<16x128xf32>
    %c0_42 = arith.constant 0 : index
    %c0_43 = arith.constant 0 : index
    %110 = vector.load %arg9[%c0_42, %c0_43] : memref<1x128xf32, #tpu.memory_space<vmem>>, vector<1x128xf32>
    %c0_44 = arith.constant 0 : index
    %c0_45 = arith.constant 0 : index
    %111 = vector.load %arg10[%c0_44, %c0_45] : memref<1x128xf32, #tpu.memory_space<vmem>>, vector<1x128xf32>
    %cst_46 = arith.constant dense<0.000000e+00> : vector<16xf32>
    %112 = vector.multi_reduction <add>, %109, %cst_46 [1] : vector<16x128xf32> to vector<16xf32>
    %113 = vector.shape_cast %112 : vector<16xf32> to vector<16x1xf32>
    %cst_47 = arith.constant 1.280000e+02 : f32
    %114 = vector.broadcast %cst_47 : f32 to vector<16x1xf32>
    %115 = arith.divf %113, %114 : vector<16x1xf32>
    %116 = vector.broadcast %115 : vector<16x1xf32> to vector<16x128xf32>
    %117 = arith.subf %109, %116 : vector<16x128xf32>
    %118 = arith.mulf %117, %117 : vector<16x128xf32>
    %cst_48 = arith.constant dense<0.000000e+00> : vector<16xf32>
    %119 = vector.multi_reduction <add>, %118, %cst_48 [1] : vector<16x128xf32> to vector<16xf32>
    %120 = vector.shape_cast %119 : vector<16xf32> to vector<16x1xf32>
    %cst_49 = arith.constant 1.280000e+02 : f32
    %121 = vector.broadcast %cst_49 : f32 to vector<16x1xf32>
    %122 = arith.divf %120, %121 : vector<16x1xf32>
    %123 = vector.broadcast %115 : vector<16x1xf32> to vector<16x128xf32>
    %124 = arith.subf %109, %123 : vector<16x128xf32>
    %cst_50 = arith.constant 9.99999974E-6 : f32
    %125 = vector.broadcast %cst_50 : f32 to vector<16x1xf32>
    %126 = arith.addf %122, %125 : vector<16x1xf32>
    %127 = math.rsqrt %126 : vector<16x1xf32>
    %128 = vector.broadcast %127 : vector<16x1xf32> to vector<16x128xf32>
    %129 = arith.mulf %124, %128 : vector<16x128xf32>
    %130 = vector.broadcast %110 : vector<1x128xf32> to vector<16x128xf32>
    %131 = arith.mulf %129, %130 : vector<16x128xf32>
    %132 = vector.broadcast %111 : vector<1x128xf32> to vector<16x128xf32>
    %133 = arith.addf %131, %132 : vector<16x128xf32>
    %cst_51 = arith.constant 0.000000e+00 : f32
    %134 = vector.broadcast %cst_51 : f32 to vector<16x128xf32>
    %135 = arith.maximumf %133, %134 : vector<16x128xf32>
    %136 = arith.truncf %135 : vector<16x128xf32> to vector<16x128xbf16>
    %c0_52 = arith.constant 0 : index
    %c0_53 = arith.constant 0 : index
    %137 = vector.load %arg11[%c0_52, %c0_53] : memref<128x128xbf16, #tpu.memory_space<vmem>>, vector<128x128xbf16>
    %cst_54 = arith.constant dense<0.000000e+00> : vector<16x128xf32>
    %138 = tpu.matmul %136, %137, %cst_54 {dimension_numbers = #tpu.dot_dimension_numbers<[1], [0], [0], [1], [0, 0, 1, 1], [], []>} : vector<16x128xbf16>, vector<128x128xbf16>, vector<16x128xf32> -> vector<16x128xf32>
    %c0_55 = arith.constant 0 : index
    %c0_56 = arith.constant 0 : index
    %139 = vector.load %arg12[%c0_55, %c0_56] : memref<1x128xf32, #tpu.memory_space<vmem>>, vector<1x128xf32>
    %140 = vector.broadcast %139 : vector<1x128xf32> to vector<16x128xf32>
    %141 = arith.addf %138, %140 : vector<16x128xf32>
    %c0_57 = arith.constant 0 : index
    %c0_58 = arith.constant 0 : index
    %142 = vector.load %arg13[%c0_57, %c0_58] : memref<16x128xf32, #tpu.memory_space<vmem>>, vector<16x128xf32>
    tpu.vector_store %arg13[%c0_57, %c0_58], %141 {strides = array<i32>} : memref<16x128xf32, #tpu.memory_space<vmem>>, vector<16x128xf32>,
    return
  }
  func.func @transform_0(%arg0: i32) -> (i32, i32) {
    %c0_i32 = arith.constant 0 : i32
    %c0_i32_0 = arith.constant 0 : i32
    return %arg0, %c0_i32 : i32, i32
  }
  func.func @transform_1(%arg0: i32) -> (i32, i32) {
    %c0_i32 = arith.constant 0 : i32
    %c0_i32_0 = arith.constant 0 : i32
    %c0_i32_1 = arith.constant 0 : i32
    return %c0_i32, %c0_i32_0 : i32, i32
  }
  func.func @transform_2(%arg0: i32) -> (i32, i32, i32) {
    %c0_i32 = arith.constant 0 : i32
    %c0_i32_0 = arith.constant 0 : i32
    %c0_i32_1 = arith.constant 0 : i32
    %c0_i32_2 = arith.constant 0 : i32
    return %c0_i32, %c0_i32_0, %c0_i32_1 : i32, i32, i32
  }
  func.func @transform_3(%arg0: i32) -> (i32, i32) {
    %c0_i32 = arith.constant 0 : i32
    %c0_i32_0 = arith.constant 0 : i32
    %c0_i32_1 = arith.constant 0 : i32
    return %c0_i32, %c0_i32_0 : i32, i32
  }
  func.func @transform_4(%arg0: i32) -> (i32, i32) {
    %c0_i32 = arith.constant 0 : i32
    %c0_i32_0 = arith.constant 0 : i32
    %c0_i32_1 = arith.constant 0 : i32
    return %c0_i32, %c0_i32_0 : i32, i32
  }
  func.func @transform_5(%arg0: i32) -> (i32, i32) {
    %c0_i32 = arith.constant 0 : i32
    %c0_i32_0 = arith.constant 0 : i32
    %c0_i32_1 = arith.constant 0 : i32
    return %c0_i32, %c0_i32_0 : i32, i32
  }
  func.func @transform_6(%arg0: i32) -> (i32, i32) {
    %c0_i32 = arith.constant 0 : i32
    %c0_i32_0 = arith.constant 0 : i32
    %c0_i32_1 = arith.constant 0 : i32
    return %c0_i32, %c0_i32_0 : i32, i32
  }
  func.func @transform_7(%arg0: i32) -> (i32, i32) {
    %c0_i32 = arith.constant 0 : i32
    %c0_i32_0 = arith.constant 0 : i32
    %c0_i32_1 = arith.constant 0 : i32
    return %c0_i32, %c0_i32_0 : i32, i32
  }
  func.func @transform_8(%arg0: i32) -> (i32, i32) {
    %c0_i32 = arith.constant 0 : i32
    %c0_i32_0 = arith.constant 0 : i32
    %c0_i32_1 = arith.constant 0 : i32
    return %c0_i32, %c0_i32_0 : i32, i32
  }
  func.func @transform_9(%arg0: i32) -> (i32, i32) {
    %c0_i32 = arith.constant 0 : i32
    %c0_i32_0 = arith.constant 0 : i32
    %c0_i32_1 = arith.constant 0 : i32
    return %c0_i32, %c0_i32_0 : i32, i32
  }
  func.func @transform_10(%arg0: i32) -> (i32, i32) {
    %c0_i32 = arith.constant 0 : i32
    %c0_i32_0 = arith.constant 0 : i32
    %c0_i32_1 = arith.constant 0 : i32
    return %c0_i32, %c0_i32_0 : i32, i32
  }
  func.func @transform_11(%arg0: i32) -> (i32, i32) {
    %c0_i32 = arith.constant 0 : i32
    %c0_i32_0 = arith.constant 0 : i32
    %c0_i32_1 = arith.constant 0 : i32
    return %c0_i32, %c0_i32_0 : i32, i32
  }
  func.func @transform_12(%arg0: i32) -> (i32, i32) {
    %c0_i32 = arith.constant 0 : i32
    %c0_i32_0 = arith.constant 0 : i32
    return %arg0, %c0_i32 : i32, i32
  }
}

</mosaic_0001>

<bundles_post_ra>
// kernel: tpu_custom_call.1
= control target key start
LH: loop header
LB: loop body
LE: loop exit
PB: predicated region body
PF: predicated region fallthrough
CT: control target
= control target key end

     0   :  { %17 = vsyncpa [#allocation3], 0  ;;  %s2408_s0 = inlined_call_operand.vmem [shape: f32[16,2], index: 0, kind: input, shape index: {}]   ;;  %s2409_s1 = inlined_call_operand.vmem [shape: f32[2,8], index: 1, kind: input, shape index: {}]   ;;  %s2410_s2 = inlined_call_operand.vmem [shape: bf16[2,17,128], index: 2, kind: input, shape index: {}]   ;;  %s2411_s3 = inlined_call_operand.vmem [shape: f32[2,128], index: 3, kind: input, shape index: {}]   ;;  %s2412_s4 = inlined_call_operand.vmem [shape: f32[2,128], index: 4, kind: input, shape index: {}]   ;;  %s2413_s5 = inlined_call_operand.vmem [shape: f32[2,128], index: 5, kind: input, shape index: {}]   ;;  %s2414_s6 = inlined_call_operand.hbm [shape: bf16[256,128], index: 6, kind: input, shape index: {}]   ;;  %s2415_s7 = inlined_call_operand.vmem [shape: f32[1,128], index: 7, kind: input, shape index: {}]   ;;  %s2416_s8 = inlined_call_operand.vmem [shape: f32[1,128], index: 8, kind: input, shape index: {}]   ;;  %s2417_s9 = inlined_call_operand.vmem [shape: f32[1,128], index: 9, kind: input, shape index: {}]   ;;  %s2418_s10 = inlined_call_operand.vmem [shape: bf16[128,128], index: 10, kind: input, shape index: {}]   ;;  %s2419_s11 = inlined_call_operand.vmem [shape: f32[1,128], index: 11, kind: input, shape index: {}]   ;;  %s2420_s12 = inlined_call_operand.hbm [shape: f32[16,128], index: 12, kind: output, shape index: {}]  }
   0x1   :  { %18 = vsyncpa [#allocation4], 0  ;;  %s1829_s21 = smov [#allocation2]  }
   0x2   :  { %s36_s22 = sshll.u32 %s1829_s21, 4  ;;  %s37_s22 = int_to_ptr.vmem [resolvable:$true] %s36_s22 }
   0x3   :  { %s1793_s23 = scalar_lea.vmem %s37_s22, 2048  ;;  %p1798_p1 = scmp.lt.s32.totalorder %s37_s22, %s37_s22 }
   0x4   :  { %p1794_p0 = scmp.ne.s32.totalorder %s37_s22, %s1793_s23  ;;  %p1799_p2 = scmp.lt.s32.totalorder %s1793_s23, %s1793_s23 }
   0x6   :  { %p1800_p3 = por %p1799_p2, %p1798_p1 }
   0x8   :  { %p1801_p4 = pnand %p1800_p3, %p1794_p0 }
   0xa   :  { %1804 = shalt.err (!%p1801_p4)
}
   0xb   :  { %s1830_s24 = smov 64   ;;  %s1831_s25 = smov 4  }
   0xc   :  { %42 = dma.hbm_to_vmem [thread:$0]  %s2414_s6, 2048, %s37_s22, [#allocation3], %s1830_s24, %s1830_s24, %s1831_s25  }
   0xd   :  { %1825 = dma.done.wait [#allocation3], 2048  }
   0xe   :  { %1826 = vsyncadd [#allocation3], 4294965248  ;;  %v1832_v0 = vmov 1   ;;  %v1833_v1 = vmov 0   ;;  %v1919_v2 = vld [vmem:[%s2408_s0] sm:$0xff]  ;;  %v1926_v3 = vld [vmem:[%s2408_s0 + $0x8] sm:$0xff]  ;;  %v71_v4 = vlaneseq }
   0xf   :  { %1705 = vset.pattern.permute.xlu0 %v1832_v0  ;;  %1706 = vset.pattern.permute.xlu1 %v1833_v1  ;;  %v59_v6 = vld [vmem:[%s2409_s1] sm:$0x1]  ;;  %v619_v7 = vld [vmem:[%s2409_s1 + $0x1] sm:$0x1]  ;;  %v1834_v51 = vmov 683565275  }
  0x10   :  { %63 = vperm.xlu1 %1706, %v1919_v2   ;;  %622 = vperm.xlu0 %1705, %v1919_v2   ;;  %v72_v5 = vshrl.u32 %v71_v4, 7  ;;  %v60_v8 = vmul.f32 6.2831855, %v59_v6  ;;  %v620_v10 = vmul.f32 6.2831855, %v619_v7  ;;  %s1840_s1 = smov 8  }
  0x11   :  { %v1835_v53 = vmov 2475754826   ;;  %v1836_v55 = vmov 2131351028   ;;  %v1837_v57 = vmov 2102212464  }
  0x12   :  { %v73_v9 = vsub.s32 0, %v72_v5  ;;  %v1838_v59 = vmov 920167782   ;;  %v1839_v6 = vmov 1326507024   ;;  %s1841_s17 = smov 16  }
  0x13   :  { %s1844_s29 = smov 15  }
  0x14   :  { %68 = vperm.xlu1 %1706, %v1926_v3   ;;  %626 = vperm.xlu0 %1705, %v1926_v3   ;;  %v74_v11 = vrot.slane %v60_v8, %v73_v9  ;;  %v632_v12 = vrot.slane %v620_v10, %v73_v9 }
  0x8b   :  { %v64_v13 = vpop.permute.xlu1 %63  ;;  %v623_v14 = vpop.permute.xlu0 %622 }
  0x8c   :  { %v1936_v15 = vmul.f32 %v74_v11, %v64_v13  ;;  %v1938_v16 = vmul.f32 %v632_v12, %v623_v14 }
  0x8e   :  { %v77_v17 = vand.u32 2147483647, %v1936_v15  ;;  %v80_v18 = vand.u32 2139095040, %v1936_v15  ;;  %v635_v19 = vand.u32 2147483647, %v1938_v16  ;;  %v638_v20 = vand.u32 2139095040, %v1938_v16 }
  0x8f   :  { %v69_v21 = vpop.permute.xlu1 %68  ;;  %v627_v25 = vpop.permute.xlu0 %626 }
  0x90   :  { %v81_v22 = vshrl.u32 %v80_v18, 23  ;;  %v84_v23 = vand.u32 8388607, %v77_v17  ;;  %v1946_v24 = vmul.f32 %v74_v11, %v69_v21  ;;  %v639_v26 = vshrl.u32 %v638_v20, 23 }
  0x91   :  { %v642_v27 = vand.u32 8388607, %v635_v19  ;;  %v1952_v32 = vmul.f32 %v632_v12, %v627_v25 }
  0x92   :  { %v1523_v28 = vadd.s32 4294967169, %v81_v22  ;;  %v180_v29 = vand.u32 2147483647, %v1946_v24  ;;  %v1545_v30 = vadd.s32 4294967169, %v639_v26  ;;  %v183_v31 = vand.u32 2139095040, %v1946_v24 }
  0x93   :  { %v85_v33 = vor.u32 8388608, %v84_v23  ;;  %v643_v35 = vor.u32 8388608, %v642_v27  ;;  %v738_v41 = vand.u32 2147483647, %v1952_v32 }
  0x94   :  { %v87_v34 = vadd.s32 1, %v1523_v28  ;;  %v645_v36 = vadd.s32 1, %v1545_v30  ;;  %v184_v37 = vshrl.u32 %v183_v31, 23  ;;  %v1956_v38 = vand.u32 8388607, %v180_v29 }
  0x95   :  { %v1959_v44 = vshll.u32 %v85_v33, 8  ;;  %v1963_v48 = vshll.u32 %v643_v35, 8 }
  0x96   :  { %vm88_vm0 = vcmp.gt.s32.totalorder %v87_v34, 0  ;;  %vm646_vm1 = vcmp.gt.s32.totalorder %v645_v36, 0  ;;  %v1527_v40 = vadd.s32 4294967169, %v184_v37  ;;  %v188_v49 = vor.u32 8388608, %v1956_v38 }
  0x97   :  { %v89_v39 = vsel %vm88_vm0, %v87_v34, 0  ;;  %v647_v45 = vsel %vm646_vm1, %v645_v36, 0 }
  0x98   :  { %v90_v42 = vshrl.u32 %v89_v39, 5  ;;  %v91_v43 = vand.u32 31, %v89_v39  ;;  %v1961_v46 = vshrl.u32 %v647_v45, 5  ;;  %v649_v47 = vand.u32 31, %v647_v45 }
  0x99   :  { %v1971_v61 = vadd.s32 1, %v1527_v40 }
  0x9a   :  { %v92_v50 = vsub.s32 32, %v91_v43  ;;  %v94_v52 = vshll.u32 %v1834_v51, %v91_v43  ;;  %v97_v54 = vshll.u32 %v1835_v53, %v91_v43  ;;  %v100_v56 = vshll.u32 %v1836_v55, %v91_v43 }
  0x9b   :  { %v103_v58 = vshll.u32 %v1837_v57, %v91_v43  ;;  %v106_v60 = vshll.u32 %v1838_v59, %v91_v43  ;;  %vm109_vm2 = vcmp.lt.s32.totalorder %v90_v42, 1  ;;  %vm110_vm3 = vcmp.lt.s32.totalorder %v90_v42, 2 }
  0x9c   :  { %v93_v62 = vshrl.u32 %v1834_v51, %v92_v50  ;;  %v95_v63 = vshrl.u32 %v1835_v53, %v92_v50  ;;  %v98_v0 = vshrl.u32 %v1836_v55, %v92_v50  ;;  %v101_v4 = vshrl.u32 %v1837_v57, %v92_v50 }
  0x9d   :  { %v104_v5 = vshrl.u32 %v1838_v59, %v92_v50  ;;  %v107_v7 = vshrl.u32 %v1839_v6, %v92_v50  ;;  %vm111_vm4 = vcmp.lt.s32.totalorder %v90_v42, 3  ;;  %v650_v11 = vsub.s32 32, %v649_v47 }
  0x9e   :  { %v96_v8 = vor.u32 %v95_v63, %v94_v52  ;;  %v99_v9 = vor.u32 %v98_v0, %v97_v54  ;;  %v102_v10 = vor.u32 %v101_v4, %v100_v56  ;;  %vm112_vm5 = vcmp.lt.s32.totalorder %v90_v42, 4 }
  0x9f   :  { %v105_v12 = vor.u32 %v104_v5, %v103_v58  ;;  %v108_v13 = vor.u32 %v107_v7, %v106_v60  ;;  %v652_v14 = vshll.u32 %v1834_v51, %v649_v47  ;;  %v655_v27 = vshll.u32 %v1835_v53, %v649_v47 }
  0xa0   :  { %v113_v18 = vsel %vm109_vm2, %v93_v62, %v96_v8  ;;  %v114_v20 = vsel %vm112_vm5, %v102_v10, 2102212464  ;;  %v117_v21 = vsel %vm109_vm2, %v96_v8, %v99_v9  ;;  %v121_v22 = vsel %vm109_vm2, %v99_v9, %v102_v10 }
  0xa1   :  { %v115_v23 = vsel %vm111_vm4, %v99_v9, %v114_v20  ;;  %v118_v25 = vsel %vm112_vm5, %v105_v12, 920167782  ;;  %v122_v26 = vsel %vm112_vm5, %v108_v13, 1326507024  ;;  %v651_v31 = vshrl.u32 %v1834_v51, %v650_v11 }
  0xa2   :  { %v119_v28 = vsel %vm111_vm4, %v102_v10, %v118_v25  ;;  %v123_v30 = vsel %vm111_vm4, %v105_v12, %v122_v26  ;;  %v653_v33 = vshrl.u32 %v1835_v53, %v650_v11  ;;  %v116_v34 = vsel %vm110_vm3, %v113_v18, %v115_v23 }
  0xa3   :  { %v120_v35 = vsel %vm110_vm3, %v117_v21, %v119_v28  ;;  %v124_v36 = vsel %vm110_vm3, %v121_v22, %v123_v30  ;;  %v656_v37 = vshrl.u32 %v1836_v55, %v650_v11  ;;  %v658_v54 = vshll.u32 %v1836_v55, %v649_v47 }
  0xa4   :  { %v1994_v39 = vmul.u32.u64.low %v1959_v44, %v124_v36  ;;  %v1995_v40 = vmul.u32.u64.high %v1959_v44, %v124_v36, %v1994_v39  ;;  %v1998_v43 = vmul.u32.u64.low %v1959_v44, %v120_v35  ;;  %v1999_v45 = vmul.u32.u64.high %v1959_v44, %v120_v35, %v1998_v43 }
  0xa5   :  { %v654_v50 = vor.u32 %v653_v33, %v652_v14  ;;  %v657_v52 = vor.u32 %v656_v37, %v655_v27  ;;  %v659_v56 = vshrl.u32 %v1837_v57, %v650_v11  ;;  %v132_v58 = vmul.u32 %v1959_v44, %v116_v34 }
  0xa6   :  { %v661_v42 = vshll.u32 %v1837_v57, %v649_v47  ;;  %v662_v60 = vshrl.u32 %v1838_v59, %v650_v11  ;;  %v665_v62 = vshrl.u32 %v1839_v6, %v650_v11  ;;  %v664_v0 = vshll.u32 %v1838_v59, %v649_v47 }
  0xa7   :  { %v660_v63 = vor.u32 %v659_v56, %v658_v54  ;;  %vm667_vm6 = vcmp.lt.s32.totalorder %v1961_v46, 1  ;;  %vm668_vm7 = vcmp.lt.s32.totalorder %v1961_v46, 2  ;;  %vm134_vm8 = vc.u32 %v1995_v40, %v1998_v43 }
  0xa8   :  { %v135_v4 = vadd.s32 1, %v1999_v45  ;;  %v663_v5 = vor.u32 %v662_v60, %v661_v42  ;;  %vm669_vm9 = vcmp.lt.s32.totalorder %v1961_v46, 3  ;;  %v666_v44 = vor.u32 %v665_v62, %v664_v0 }
  0xa9   :  { %vm670_vm10 = vcmp.lt.s32.totalorder %v1961_v46, 4  ;;  %v671_v7 = vsel %vm667_vm6, %v651_v31, %v654_v50  ;;  %v675_v8 = vsel %vm667_vm6, %v654_v50, %v657_v52  ;;  %v679_v11 = vsel %vm667_vm6, %v657_v52, %v660_v63 }
  0xaa   :  { %v136_v9 = vsel %vm134_vm8, %v135_v4, %v1999_v45  ;;  %v672_v10 = vsel %vm670_vm10, %v660_v63, 2102212464  ;;  %v676_v47 = vsel %vm670_vm10, %v663_v5, 920167782  ;;  %v680_v18 = vsel %vm670_vm10, %v666_v44, 1326507024 }
  0xab   :  { %v137_v12 = vadd.s32 %v136_v9, %v132_v58  ;;  %v673_v13 = vsel %vm669_vm9, %v657_v52, %v672_v10  ;;  %v677_v14 = vsel %vm669_vm9, %v660_v63, %v676_v47  ;;  %v681_v21 = vsel %vm669_vm9, %v663_v5, %v680_v18 }
  0xac   :  { %v678_v20 = vsel %vm668_vm7, %v675_v8, %v677_v14  ;;  %vm191_vm11 = vcmp.gt.s32.totalorder %v1971_v61, 0  ;;  %v741_v22 = vand.u32 2139095040, %v1952_v32  ;;  %v682_v25 = vsel %vm668_vm7, %v679_v11, %v681_v21 }
  0xad   :  { %v138_v23 = vadd.s32 536870912, %v137_v12  ;;  %v2022_v26 = vmul.u32.u64.low %v1963_v48, %v678_v20  ;;  %v2023_v27 = vmul.u32.u64.high %v1963_v48, %v678_v20, %v2022_v26  ;;  %v674_v28 = vsel %vm668_vm7, %v671_v7, %v673_v13 }
  0xae   :  { %v2029_v30 = vmul.u32.u64.low %v1963_v48, %v682_v25  ;;  %v2030_v31 = vmul.u32.u64.high %v1963_v48, %v682_v25, %v2029_v30  ;;  %v192_v33 = vsel %vm191_vm11, %v1971_v61, 0  ;;  %v2036_v36 = vadd.s32 %v1998_v43, %v1995_v40 }
  0xaf   :  { %v2033_v34 = vshrl.u32 %v138_v23, 30  ;;  %v194_v35 = vand.u32 31, %v192_v33  ;;  %v2040_v37 = vshll.u32 %v188_v49, 8  ;;  %v742_v39 = vshrl.u32 %v741_v22, 23 }
  0xb0   :  { %v2044_v46 = vand.u32 8388607, %v738_v41  ;;  %v690_v50 = vmul.u32 %v1963_v48, %v674_v28  ;;  %v693_v61 = vadd.s32 1, %v2023_v27  ;;  %vm692_vm12 = vc.u32 %v2030_v31, %v2022_v26 }
  0xb1   :  { %v140_v45 = vshll.u32 %v2033_v34, 30  ;;  %v195_v52 = vsub.s32 32, %v194_v35  ;;  %v193_v40 = vshrl.u32 %v192_v33, 5  ;;  %v197_v38 = vshll.u32 %v1834_v51, %v194_v35 }
  0xb2   :  { %v200_v49 = vshll.u32 %v1835_v53, %v194_v35  ;;  %v694_v54 = vsel %vm692_vm12, %v693_v61, %v2023_v27  ;;  %v203_v58 = vshll.u32 %v1836_v55, %v194_v35  ;;  %v206_v62 = vshll.u32 %v1837_v57, %v194_v35 }
  0xb3   :  { %v2053_v43 = vsub.s32 %v137_v12, %v140_v45  ;;  %v198_v56 = vshrl.u32 %v1835_v53, %v195_v52  ;;  %v695_v48 = vadd.s32 %v694_v54, %v690_v50  ;;  %v201_v42 = vshrl.u32 %v1836_v55, %v195_v52 }
  0xb4   :  { %v204_v60 = vshrl.u32 %v1837_v57, %v195_v52  ;;  %v207_v4 = vshrl.u32 %v1838_v59, %v195_v52  ;;  %v209_v5 = vshll.u32 %v1838_v59, %v194_v35  ;;  %v210_v9 = vshrl.u32 %v1839_v6, %v195_v52 }
  0xb5   :  { %v143_v63 = vsub.s32 0, %v2053_v43  ;;  %v199_v0 = vor.u32 %v198_v56, %v197_v38  ;;  %v696_v44 = vadd.s32 536870912, %v695_v48  ;;  %v202_v7 = vor.u32 %v201_v42, %v200_v49 }
  0xb6   :  { %v205_v8 = vor.u32 %v204_v60, %v203_v58  ;;  %v196_v47 = vshrl.u32 %v1834_v51, %v195_v52  ;;  %v208_v11 = vor.u32 %v207_v4, %v206_v62  ;;  %v1549_v12 = vadd.s32 4294967169, %v742_v39 }
  0xb7   :  { %v1524_v10 = vmin.u32 %v143_v63, %v2053_v43  ;;  %v2067_v13 = vshrl.u32 %v696_v44, 30  ;;  %v211_v14 = vor.u32 %v210_v9, %v209_v5  ;;  %vm212_vm13 = vcmp.lt.s32.totalorder %v193_v40, 1 }
  0xb8   :  { %vm215_vm14 = vcmp.lt.s32.totalorder %v193_v40, 4  ;;  %vm213_vm15 = vcmp.lt.s32.totalorder %v193_v40, 2  ;;  %v220_v21 = vsel %vm212_vm13, %v199_v0, %v202_v7  ;;  %vm214_vm0 = vcmp.lt.s32.totalorder %v193_v40, 3 }
  0xb9   :  { %v145_v18 = vclz %v1524_v10  ;;  %v217_v20 = vsel %vm215_vm14, %v205_v8, 2102212464  ;;  %v698_v22 = vshll.u32 %v2067_v13, 30  ;;  %v221_v23 = vsel %vm215_vm14, %v208_v11, 920167782 }
  0xba   :  { %v224_v25 = vsel %vm212_vm13, %v202_v7, %v205_v8  ;;  %v216_v28 = vsel %vm212_vm13, %v196_v47, %v199_v0  ;;  %v222_v30 = vsel %vm214_vm0, %v205_v8, %v221_v23  ;;  %v225_v33 = vsel %vm215_vm14, %v211_v14, 1326507024 }
  0xbb   :  { %v1525_v27 = vadd.s32 4294967294, %v145_v18  ;;  %v2070_v35 = vsub.s32 %v695_v48, %v698_v22  ;;  %v218_v39 = vsel %vm214_vm0, %v202_v7, %v217_v20  ;;  %v223_v45 = vsel %vm213_vm15, %v220_v21, %v222_v30 }
  0xbc   :  { %v226_v50 = vsel %vm214_vm0, %v208_v11, %v225_v33  ;;  %v2075_v52 = vmul.u32.u64.low %v2040_v37, %v223_v45  ;;  %v2076_v38 = vmul.u32.u64.high %v2040_v37, %v223_v45, %v2075_v52  ;;  %v219_v60 = vsel %vm213_vm15, %v216_v28, %v218_v39 }
  0xbd   :  { %vm1526_vm1 = vcmp.lt.s32.totalorder %v1525_v27, 0  ;;  %v227_v61 = vsel %vm213_vm15, %v224_v25, %v226_v50  ;;  %v701_v54 = vsub.s32 0, %v2070_v35  ;;  %v748_v62 = vadd.s32 1, %v1549_v12 }
  0xbe   :  { %v148_v49 = vsel %vm1526_vm1, 0, %v1525_v27  ;;  %v2081_v56 = vmul.u32.u64.low %v2040_v37, %v227_v61  ;;  %v2082_v58 = vmul.u32.u64.high %v2040_v37, %v227_v61, %v2081_v56  ;;  %vm79_vm2 = vcmp.lt.s32.totalorder %v1936_v15, 0 }
  0xbf   :  { %v149_v48 = vsub.s32 32, %v148_v49  ;;  %v153_v42 = vsub.s32 4294967266, %v148_v49  ;;  %v150_v63 = vshll.u32 %v2053_v43, %v148_v49  ;;  %v1546_v0 = vmin.u32 %v701_v54, %v2070_v35 }
  0xc0   :  { %v163_v4 = vsub.s32 4, %v2033_v34  ;;  %v238_v7 = vadd.s32 1, %v2076_v38  ;;  %vm749_vm3 = vcmp.gt.s32.totalorder %v748_v62, 0  ;;  %v235_v9 = vmul.u32 %v2040_v37, %v219_v60 }
  0xc1   :  { %v151_v5 = vshrl.u32 %v2036_v36, %v149_v48  ;;  %v154_v44 = vadd.s32 127, %v153_v42  ;;  %v703_v8 = vclz %v1546_v0  ;;  %vm237_vm4 = vc.u32 %v2082_v58, %v2075_v52 }
  0xc2   :  { %v750_v40 = vsel %vm749_vm3, %v748_v62, 0  ;;  %v239_v43 = vsel %vm237_vm4, %v238_v7, %v2076_v38  ;;  %v746_v11 = vor.u32 8388608, %v2044_v46  ;;  %vm2100_vm5 = vcmp.le.f32.partialorder %v77_v17, 0.7853982 }
  0xc3   :  { %v152_v10 = vor.u32 %v151_v5, %v150_v63  ;;  %v155_v47 = vshll.u32 %v154_v44, 23  ;;  %v1547_v12 = vadd.s32 4294967294, %v703_v8  ;;  %v240_v14 = vadd.s32 %v239_v43, %v235_v9 }
  0xc4   :  { %v2096_v36 = vshrl.u32 %v750_v40, 5  ;;  %v752_v18 = vand.u32 31, %v750_v40  ;;  %v691_v22 = vadd.s32 %v2022_v26, %v2030_v31  ;;  %v2109_v23 = vsel %vm79_vm2, %v163_v4, %v2033_v34 }
  0xc5   :  { %v156_v37 = vor.u32 4788187, %v155_v47  ;;  %v159_v21 = vcvt.s32.f32 %v152_v10  ;;  %vm1548_vm6 = vcmp.lt.s32.totalorder %v1547_v12, 0  ;;  %v241_v25 = vadd.s32 536870912, %v240_v14 }
  0xc6   :  { %v753_v27 = vsub.s32 32, %v752_v18  ;;  %v755_v28 = vshll.u32 %v1834_v51, %v752_v18  ;;  %v706_v17 = vsel %vm1548_vm6, 0, %v1547_v12  ;;  %v758_v33 = vshll.u32 %v1835_v53, %v752_v18 }
  0xc7   :  { %v157_v30 = vand.u32 2147483647, %v156_v37  ;;  %v761_v39 = vshll.u32 %v1836_v55, %v752_v18  ;;  %v707_v45 = vsub.s32 32, %v706_v17  ;;  %v708_v50 = vshll.u32 %v2070_v35, %v706_v17 }
  0xc8   :  { %v711_v26 = vsub.s32 4294967266, %v706_v17  ;;  %v2115_v31 = vshrl.u32 %v241_v25, 30  ;;  %vm770_vm7 = vcmp.lt.s32.totalorder %v2096_v36, 1  ;;  %v754_v61 = vshrl.u32 %v1834_v51, %v753_v27 }
  0xc9   :  { %v160_v34 = vmul.f32 %v159_v21, %v157_v30  ;;  %v756_v38 = vshrl.u32 %v1835_v53, %v753_v27  ;;  %v759_v49 = vshrl.u32 %v1836_v55, %v753_v27  ;;  %v709_v54 = vshrl.u32 %v691_v22, %v707_v45 }
  0xca   :  { %v712_v56 = vadd.s32 127, %v711_v26  ;;  %v243_v48 = vshll.u32 %v2115_v31, 30  ;;  %v762_v42 = vshrl.u32 %v1837_v57, %v753_v27  ;;  %vm771_vm8 = vcmp.lt.s32.totalorder %v2096_v36, 2 }
  0xcb   :  { %v161_v35 = vxor.u32 2147483648, %v160_v34  ;;  %v757_v60 = vor.u32 %v756_v38, %v755_v28  ;;  %v760_v62 = vor.u32 %v759_v49, %v758_v33  ;;  %v764_v63 = vshll.u32 %v1837_v57, %v752_v18 }
  0xcc   :  { %v710_v0 = vor.u32 %v709_v54, %v708_v50  ;;  %v713_v4 = vshll.u32 %v712_v56, 23  ;;  %v244_v51 = vsub.s32 %v240_v14, %v243_v48  ;;  %v763_v5 = vor.u32 %v762_v42, %v761_v39 }
  0xcd   :  { %v162_v53 = vsel %vm79_vm2, %v161_v35, %v160_v34  ;;  %vm637_vm9 = vcmp.lt.s32.totalorder %v1938_v16, 0  ;;  %v765_v55 = vshrl.u32 %v1838_v59, %v753_v27  ;;  %v767_v44 = vshll.u32 %v1838_v59, %v752_v18 }
  0xce   :  { %v768_v7 = vshrl.u32 %v1839_v6, %v753_v27  ;;  %v165_v8 = vsel %vm2100_vm5, %v1936_v15, %v162_v53  ;;  %vm2136_vm10 = vcmp.le.f32.partialorder %v635_v19, 0.7853982  ;;  %v714_v9 = vor.u32 4788187, %v713_v4 }
  0xcf   :  { %v717_v40 = vcvt.s32.f32 %v710_v0  ;;  %v246_v10 = vsub.s32 0, %v244_v51  ;;  %1755 = vcosq.f32 %v165_v8  ;;  %v766_v47 = vor.u32 %v765_v55, %v764_v63 }
  0xd0   :  { %v769_v43 = vor.u32 %v768_v7, %v767_v44  ;;  %vm772_vm11 = vcmp.lt.s32.totalorder %v2096_v36, 3  ;;  %1757 = vsinq.f32 %v165_v8  ;;  %v715_v59 = vand.u32 2147483647, %v714_v9 }
  0xd1   :  { %v1528_v6 = vmin.u32 %v246_v10, %v244_v51  ;;  %vm773_vm12 = vcmp.lt.s32.totalorder %v2096_v36, 4  ;;  %v774_v12 = vsel %vm770_vm7, %v754_v61, %v757_v60  ;;  %v778_v14 = vsel %vm770_vm7, %v757_v60, %v760_v62 }
  0xd2   :  { %v775_v19 = vsel %vm773_vm12, %v763_v5, 2102212464  ;;  %v779_v18 = vsel %vm773_vm12, %v766_v47, 920167782  ;;  %v718_v37 = vmul.f32 %v717_v40, %v715_v59  ;;  %v782_v28 = vsel %vm770_vm7, %v760_v62, %v763_v5 }
  0xd3   :  { %v248_v21 = vclz %v1528_v6  ;;  %v776_v22 = vsel %vm772_vm11, %v760_v62, %v775_v19  ;;  %v780_v25 = vsel %vm772_vm11, %v763_v5, %v779_v18  ;;  %v783_v30 = vsel %vm773_vm12, %v769_v43, 1326507024 }
  0xd4   :  { %v781_v27 = vsel %vm771_vm8, %v778_v14, %v780_v25  ;;  %v786_v17 = vshll.u32 %v746_v11, 8  ;;  %v719_v33 = vxor.u32 2147483648, %v718_v37  ;;  %v777_v45 = vsel %vm771_vm8, %v774_v12, %v776_v22 }
  0xd5   :  { %v1529_v39 = vadd.s32 4294967294, %v248_v21  ;;  %v784_v50 = vsel %vm772_vm11, %v766_v47, %v783_v30  ;;  %v2169_v46 = vsel %vm2100_vm5, 0, %v2109_v23  ;;  %v236_v56 = vadd.s32 %v2075_v52, %v2082_v58 }
  0xd6   :  { %v785_v26 = vsel %vm771_vm8, %v782_v28, %v784_v50  ;;  %v2162_v34 = vmul.u32.u64.low %v786_v17, %v781_v27  ;;  %v2163_v61 = vmul.u32.u64.high %v786_v17, %v781_v27, %v2162_v34  ;;  %v720_v11 = vsel %vm637_vm9, %v719_v33, %v718_v37 }
  0xd7   :  { %vm1530_vm13 = vcmp.lt.s32.totalorder %v1529_v39, 0  ;;  %v2173_v38 = vmul.u32.u64.low %v786_v17, %v785_v26  ;;  %v2174_v49 = vmul.u32.u64.high %v786_v17, %v785_v26, %v2173_v38  ;;  %v723_v36 = vsel %vm2136_vm10, %v1938_v16, %v720_v11 }
  0xd8   :  { %v251_v54 = vsel %vm1530_vm13, 0, %v1529_v39  ;;  %1759 = vcosq.f32 %v723_v36  ;;  %v793_v23 = vmul.u32 %v786_v17, %v777_v45  ;;  %v796_v42 = vadd.s32 1, %v2163_v61 }
  0xd9   :  { %v252_v48 = vsub.s32 32, %v251_v54  ;;  %v256_v20 = vsub.s32 4294967266, %v251_v54  ;;  %1761 = vsinq.f32 %v723_v36  ;;  %v170_v35 = vand.u32 3, %v2169_v46 }
  0xda   :  { %v253_v60 = vshll.u32 %v244_v51, %v251_v54  ;;  %vm795_vm14 = vc.u32 %v2174_v49, %v2162_v34  ;;  %v721_v9 = vsub.s32 4, %v2067_v13  ;;  %vm169_vm2 = vweird.f32 %v1936_v15 }
  0xdb   :  { %v254_v62 = vshrl.u32 %v236_v56, %v252_v48  ;;  %v257_v63 = vadd.s32 127, %v256_v20  ;;  %v797_v0 = vsel %vm795_vm14, %v796_v42, %v2163_v61  ;;  %vm175_vm15 = vcmp.eq.s32.totalorder %v170_v35, 2 }
  0xdc   :  { %v2186_v4 = vpop.eup %1755  ;;  %v798_v58 = vadd.s32 %v797_v0, %v793_v23  ;;  %vm171_vm0 = vcmp.lt.s32.totalorder %v170_v35, 2  ;;  %vm172_vm1 = vcmp.eq.s32.totalorder %v170_v35, 0  ;;  %v722_v37 = vsel %vm637_vm9, %v721_v9, %v2067_v13 }
  0xdd   :  { %v255_v5 = vor.u32 %v254_v62, %v253_v60  ;;  %v258_v52 = vshll.u32 %v257_v63, 23  ;;  %v2188_v53 = vpop.eup %1757  ;;  %v176_v55 = vxor.u32 2147483648, %v2186_v4  ;;  %vm2214_vm3 = vcmp.le.f32.partialorder %v180_v29, 0.7853982 }
  0xde   :  { %v799_v7 = vadd.s32 536870912, %v798_v58  ;;  %v173_v51 = vxor.u32 2147483648, %v2188_v53  ;;  %vm182_vm4 = vcmp.lt.s32.totalorder %v1946_v24, 0  ;;  %v266_v25 = vsub.s32 4, %v2115_v31 }
  0xdf   :  { %v259_v44 = vor.u32 4788187, %v258_v52  ;;  %v177_v8 = vsel %vm175_vm15, %v176_v55, %v2188_v53  ;;  %v262_v10 = vcvt.s32.f32 %v255_v5  ;;  %v2222_v27 = vsel %vm2136_vm10, 0, %v722_v37 }
  0xe0   :  { %v2196_v47 = vshrl.u32 %v799_v7, 30  ;;  %v174_v43 = vsel %vm172_vm1, %v2186_v4, %v173_v51  ;;  %v728_v17 = vand.u32 3, %v2222_v27  ;;  %v267_v57 = vsel %vm182_vm4, %v266_v25, %v2115_v31 }
  0xe1   :  { %v260_v40 = vand.u32 2147483647, %v259_v44  ;;  %v178_v59 = vsel %vm171_vm0, %v174_v43, %v177_v8  ;;  %v376_v11 = vadd.s32 3, %v2169_v46  ;;  %vm727_vm8 = vweird.f32 %v1938_v16 }
  0xe2   :  { %v801_v12 = vshll.u32 %v2196_v47, 30  ;;  %v2205_v19 = vsel %vm169_vm2, nan, %v178_v59  ;;  %vm730_vm5 = vcmp.eq.s32.totalorder %v728_v17, 0  ;;  %vm733_vm6 = vcmp.eq.s32.totalorder %v728_v17, 2 }
  0xe3   :  { %v263_v6 = vmul.f32 %v262_v10, %v260_v40  ;;  %vm729_vm7 = vcmp.lt.s32.totalorder %v728_v17, 2  ;;  %v269_v31 = vsel %vm2214_vm3, 0, %v267_v57  ;;  %v377_v48 = vand.u32 3, %v376_v11 }
  0xe4   :  { %v802_v18 = vsub.s32 %v798_v58, %v801_v12  ;;  %v480_v20 = vadd.s32 3, %v269_v31  ;;  %v794_v23 = vadd.s32 %v2162_v34, %v2174_v49  ;;  %v273_v35 = vand.u32 3, %v269_v31 }
  0xe5   :  { %v264_v14 = vxor.u32 2147483648, %v263_v6  ;;  %v2210_v21 = vpop.eup %1759  ;;  %vm379_vm10 = vcmp.eq.s32.totalorder %v377_v48, 0  ;;  %vm382_vm11 = vcmp.eq.s32.totalorder %v377_v48, 2  ;;  %vm378_vm14 = vcmp.lt.s32.totalorder %v377_v48, 2  ;;  %v1729_v48 = vld [vmem:[%s2410_s2] sm:$0xff]  }
  0xe6   :  { %v2224_v28 = vpop.eup %1761  ;;  %v804_v13 = vsub.s32 0, %v802_v18  ;;  %v734_v33 = vxor.u32 2147483648, %v2210_v21  ;;  %v481_v0 = vand.u32 3, %v480_v20  ;;  %v381_v58 = vsel %vm379_vm10, %v2186_v4, %v173_v51  ;;  %v1730_v20 = vld [vmem:[%s2410_s2 + $0xc] sm:$0xff]  }
  0xe7   :  { %v265_v30 = vsel %vm182_vm4, %v264_v14, %v263_v6  ;;  %v731_v39 = vxor.u32 2147483648, %v2224_v28  ;;  %v384_v44 = vsel %vm382_vm11, %v176_v55, %v2188_v53  ;;  %vm275_vm12 = vcmp.eq.s32.totalorder %v273_v35, 0 }
  0xe8   :  { %v268_v29 = vsel %vm2214_vm3, %v1946_v24, %v265_v30  ;;  %v1550_v45 = vmin.u32 %v804_v13, %v802_v18  ;;  %v735_v61 = vsel %vm733_vm6, %v734_v33, %v2224_v28  ;;  %vm278_vm13 = vcmp.eq.s32.totalorder %v273_v35, 2 }
  0xe9   :  { %1763 = vcosq.f32 %v268_v29  ;;  %v732_v50 = vsel %vm730_vm5, %v2210_v21, %v731_v39  ;;  %v385_v40 = vsel %vm378_vm14, %v381_v58, %v384_v44  ;;  %vm483_vm15 = vcmp.eq.s32.totalorder %v481_v0, 0 }
  0xea   :  { %1765 = vsinq.f32 %v268_v29  ;;  %v806_v26 = vclz %v1550_v45  ;;  %v736_v38 = vsel %vm729_vm7, %v732_v50, %v735_v61  ;;  %vm486_vm0 = vcmp.eq.s32.totalorder %v481_v0, 2 }
  0xeb   :  { %v2245_v54 = vsel %vm727_vm8, nan, %v736_v38  ;;  %vm274_vm1 = vcmp.lt.s32.totalorder %v273_v35, 2  ;;  %vm482_vm3 = vcmp.lt.s32.totalorder %v481_v0, 2  ;;  %vm272_vm4 = vweird.f32 %v1946_v24 }
  0xec   :  { %v1551_v36 = vadd.s32 4294967294, %v806_v26  ;;  %v386_v14 = vsel %vm169_vm2, nan, %v385_v40  ;;  %vm740_vm5 = vcmp.lt.s32.totalorder %v1952_v32, 0  ;;  %v824_v30 = vsub.s32 4, %v2196_v47 }
  0xed   :  { %vm739_vm6 = vcmp.le.f32.partialorder %v738_v41, 0.7853982  ;;  %v1722_v15 = vpack.i.bf16 %v1926_v3, %v1919_v2  ;;  %v934_v29 = vadd.s32 3, %v2222_v27  ;;  %vm533_vm2 = vcmask 1040384  }
  0xee   :  { %vm1552_vm9 = vcmp.lt.s32.totalorder %v1551_v36, 0  ;;  %v825_v17 = vsel %vm740_vm5, %v824_v30, %v2196_v47  ;;  %v535_v50 = vsel %vm533_vm2, 65535, %v1833_v1  ;;  %v1727_v3 = vld [vmem:[%s2410_s2 + $0x8] ss:$0 sps:$4 sm:$0x11]   ;;  %v1842_v61 = vmov 0.0  }
  0xef   :  { %v809_v56 = vsel %vm1552_vm9, 0, %v1551_v36  ;;  %v827_v45 = vsel %vm739_vm6, 0, %v825_v17  ;;  %v935_v57 = vand.u32 3, %v934_v29  ;;  %1635 = vmatprep.subr.bf16.mxu0 %v1842_v61  ;;  %1643 = vmatprep.subr.bf16.mxu1 %v1842_v61  ;;  %v1728_v1 = vld [vmem:[%s2410_s2 + $0x14] ss:$0 sps:$4 sm:$0x11]   ;;  %v537_v38 = vand.u32 %v1727_v3, %v535_v50 }
  0xf0   :  { %v810_v42 = vsub.s32 32, %v809_v56  ;;  %v814_v46 = vsub.s32 4294967266, %v809_v56  ;;  %v811_v60 = vshll.u32 %v802_v18, %v809_v56  ;;  %v1038_v41 = vadd.s32 3, %v827_v45  ;;  %v1539_v17 = vld [vmem:[%s2411_s3] ss:$0 sm:$0xff] }
  0xf1   :  { %v831_v26 = vand.u32 3, %v827_v45  ;;  %vm937_vm7 = vcmp.eq.s32.totalorder %v935_v57, 0  ;;  %vm940_vm9 = vcmp.eq.s32.totalorder %v935_v57, 2  ;;  %vm936_vm11 = vcmp.lt.s32.totalorder %v935_v57, 2  ;;  %1636 = vmatpush3.bf16.msra.mxu0 %v537_v38 }
  0xf2   :  { %v812_v62 = vshrl.u32 %v794_v23, %v810_v42  ;;  %v815_v63 = vadd.s32 127, %v814_v46  ;;  %v1039_v2 = vand.u32 3, %v1038_v41  ;;  %v939_v47 = vsel %vm937_vm7, %v2210_v21, %v731_v39  ;;  %1637 = vmatprep.subr.bf16.mxu0 %v1842_v61 }
  0xf3   :  { %v942_v27 = vsel %vm940_vm9, %v734_v33, %v2224_v28  ;;  %vm833_vm10 = vcmp.eq.s32.totalorder %v831_v26, 0  ;;  %v1090_v39 = vand.u32 %v1728_v1, %v535_v50 }
  0xf4   :  { %v813_v5 = vor.u32 %v812_v62, %v811_v60  ;;  %v816_v52 = vshll.u32 %v815_v63, 23  ;;  %v943_v21 = vsel %vm936_vm11, %v939_v47, %v942_v27  ;;  %vm1041_vm14 = vcmp.eq.s32.totalorder %v1039_v2, 0 }
  0xf5   :  { %1644 = vmatpush3.bf16.msra.mxu1 %v1090_v39  ;;  %v944_v60 = vsel %vm727_vm8, nan, %v943_v21  ;;  %1638 = vmatpush3.bf16.msra.mxu0 %v1729_v48  ;;  %vm505_vm8 = vcmask 64512  }
  0xf6   :  { %v1764_v34 = vpop.eup %1763  ;;  %v817_v7 = vor.u32 4788187, %v816_v52  ;;  %v820_v43 = vcvt.s32.f32 %v813_v5  ;;  %1645 = vmatprep.subr.bf16.mxu1 %v1842_v61  ;;  %v1784_v5 = vld [vmem:[%s2408_s0 + $0x8] sm:$0xff] }
  0xf7   :  { %v1766_v49 = vpop.eup %1765  ;;  %v279_v8 = vxor.u32 2147483648, %v1764_v34 }
  0xf8   :  { %v276_v9 = vxor.u32 2147483648, %v1766_v49  ;;  %v818_v10 = vand.u32 2147483647, %v817_v7 }
  0xf9   :  { %v488_v59 = vsel %vm486_vm0, %v279_v8, %v1766_v49  ;;  %v280_v6 = vsel %vm278_vm13, %v279_v8, %v1766_v49  ;;  %vm1044_vm13 = vcmp.eq.s32.totalorder %v1039_v2, 2  ;;  %vm1040_vm0 = vcmp.lt.s32.totalorder %v1039_v2, 2  ;;  %1646 = vmatpush3.bf16.msra.mxu1 %v1730_v20 }
  0xfa   :  { %v485_v51 = vsel %vm483_vm15, %v1764_v34, %v276_v9  ;;  %v277_v4 = vsel %vm275_vm12, %v1764_v34, %v276_v9  ;;  %v821_v53 = vmul.f32 %v820_v43, %v818_v10  ;;  %vm836_vm12 = vcmp.eq.s32.totalorder %v831_v26, 2  ;;  %1651 = vmatprep.subr.bf16.mxu1 %v1842_v61 }
  0xfb   :  { %v489_v55 = vsel %vm482_vm3, %v485_v51, %v488_v59  ;;  %v281_v12 = vsel %vm274_vm1, %v277_v4, %v280_v6  ;;  %vm832_vm15 = vcmp.lt.s32.totalorder %v831_v26, 2  ;;  %vm1843_vm1 = vmmov 0  }
  0xfc   :  { %v490_v18 = vsel %vm272_vm4, nan, %v489_v55  ;;  %v2259_v37 = vsel %vm272_vm4, nan, %v281_v12  ;;  %v822_v22 = vxor.u32 2147483648, %v821_v53  ;;  %1639 = vmatprep.mubr.msk.bf16.mxu0 %vm1843_vm1, %v1842_v61  ;;  %vm830_vm3 = vweird.f32 %v1952_v32  ;;  %1647 = vmatprep.mubr.msk.bf16.mxu1 %vm1843_vm1, %v1842_v61 }
  0xfd   :  { %v1717_v25 = vpack.i.bf16 %v490_v18, %v386_v14  ;;  %vm508_vm4 = vcmask 130048  }
  0xfe   :  { %v823_v13 = vsel %vm740_vm5, %v822_v22, %v821_v53  ;;  %vm529_vm5 = vcmask 138240  }
  0xff   :  { %1718 = vrot.lane.b32.xlu1 %v1717_v25, %s1840_s1  ;;  %v826_v24 = vsel %vm739_vm6, %v1952_v32, %v823_v13  ;;  %v1783_v32 = vld [vmem:[%s2408_s0] sm:$0xff] }
 0x100   :  { %1767 = vcosq.f32 %v826_v24  ;;  %v1712_v52 = vpack.i.bf16 %v1784_v5, %v1783_v32  ;;  %v1739_v32 = vld [vmem:[#allocation2 + $0x58] sm:$0xff]  }
 0x101   :  { %1769 = vsinq.f32 %v826_v24  ;;  %v1740_v5 = vld [vmem:[#allocation2 + $0x18] sm:$0xff]  }
 0x103   :  { %1723 = vrot.lane.b32.xlu1 %v1722_v15, %s1841_s17  ;;  %v1564_v15 = vld [vmem:[%s2411_s3 + $0x1] ss:$0 sm:$0xff] }
 0x10d   :  { %v1768_v11 = vpop.eup %1767 }
 0x10e   :  { %v1770_v36 = vpop.eup %1769  ;;  %v837_v31 = vxor.u32 2147483648, %v1768_v11 }
 0x10f   :  { %v834_v56 = vxor.u32 2147483648, %v1770_v36 }
 0x110   :  { %v1046_v28 = vsel %vm1044_vm13, %v837_v31, %v1770_v36  ;;  %v838_v33 = vsel %vm836_vm12, %v837_v31, %v1770_v36 }
 0x111   :  { %v1043_v23 = vsel %vm1041_vm14, %v1768_v11, %v834_v56  ;;  %v835_v42 = vsel %vm833_vm10, %v1768_v11, %v834_v56 }
 0x112   :  { %v1047_v46 = vsel %vm1040_vm0, %v1043_v23, %v1046_v28  ;;  %v839_v35 = vsel %vm832_vm15, %v835_v42, %v838_v33  ;;  %v1731_v23 = vld [vmem:[#allocation2 + $0x78] sm:$0xff]  }
 0x113   :  { %v1048_v62 = vsel %vm830_vm3, nan, %v1047_v46  ;;  %v840_v63 = vsel %vm830_vm3, nan, %v839_v35  ;;  %v1732_v42 = vld [vmem:[#allocation2 + $0x38] sm:$0xff]   ;;  %1604 = vmatprep.subr.bf16.mxu0 %v1731_v23  ;;  %v1733_v46 = vld [vmem:[#allocation2 + $0x70] sm:$0xff]  }
 0x114   :  { %v1707_v0 = vpack.i.bf16 %v1048_v62, %v944_v60  ;;  %v1734_v35 = vld [vmem:[#allocation2 + $0x30] sm:$0xff]   ;;  %v1735_v60 = vld [vmem:[#allocation2 + $0x68] sm:$0xff]  }
 0x115   :  { %v1736_v62 = vld [vmem:[#allocation2 + $0x28] sm:$0xff]  }
 0x116   :  { %1708 = vrot.lane.b32.xlu0 %v1707_v0, %s1840_s1  ;;  %v1738_v0 = vld [vmem:[#allocation2 + $0x20] sm:$0xff]  }
 0x11a   :  { %1713 = vrot.lane.b32.xlu0 %v1712_v52, %s1844_s29  ;;  %v1741_v52 = vld [vmem:[#allocation2 + $0x50] sm:$0xff]  }
 0x171   :  { %v1719_v16 = vpop.permute.xlu1 %1718 }
 0x172   :  { %v1721_v58 = vunpack.i.h.bf16 %v1719_v16  ;;  %v1720_v44 = vunpack.i.l.bf16 %v1719_v16  ;;  %v1742_v16 = vld [vmem:[#allocation2 + $0x10] sm:$0xff]  }
 0x174   :  { %v506_v8 = vsel %vm505_vm8, %v2205_v19, %v1720_v44  ;;  %v507_v9 = vsel %vm505_vm8, %v2259_v37, %v1721_v58  ;;  %v1743_v58 = vld [vmem:[#allocation2 + $0x48] sm:$0xff]  }
 0x175   :  { %v1724_v34 = vpop.permute.xlu1 %1723  ;;  %v1744_v44 = vld [vmem:[#allocation2 + $0x8] sm:$0xff]  }
 0x176   :  { %v1726_v49 = vunpack.i.h.bf16 %v1724_v34  ;;  %v1725_v7 = vunpack.i.l.bf16 %v1724_v34  ;;  %v1745_v34 = vld [vmem:[#allocation2 + $0x40] sm:$0xff]  }
 0x178   :  { %v509_v40 = vsel %vm508_vm4, %v506_v8, %v1725_v7  ;;  %v510_v10 = vsel %vm508_vm4, %v507_v9, %v1726_v49  ;;  %v1746_v49 = vld [vmem:[#allocation2] sm:$0xff]  }
 0x179   :  { %v511_v43 = vpack.c.bf16 %v510_v10, %v509_v40 }
 0x17b   :  { %1640 = vmatmul.mubr.msk.bf16.vlgmr.msra.gmra.mxu0 %vm529_vm5, %v511_v43 }
 0x17c   :  { %1605 = vmatpush3.bf16.msra.mxu0 %v1732_v42 }
 0x17d   :  { %1606 = vmatprep.subr.bf16.mxu0 %v1733_v46 }
 0x180   :  { %1607 = vmatpush3.bf16.msra.mxu0 %v1734_v35 }
 0x181   :  { %1608 = vmatprep.subr.bf16.mxu0 %v1735_v60 }
 0x184   :  { %1609 = vmatpush3.bf16.msra.mxu0 %v1736_v62 }
 0x188   :  { %v1709_v59 = vpop.permute.xlu0 %1708 }
 0x189   :  { %v1711_v6 = vunpack.i.h.bf16 %v1709_v59  ;;  %v1710_v51 = vunpack.i.l.bf16 %v1709_v59 }
 0x18b   :  { %v1063_v12 = vsel %vm505_vm8, %v2245_v54, %v1710_v51  ;;  %v1064_v19 = vsel %vm505_vm8, %v840_v63, %v1711_v6  ;;  %v1737_v63 = vld [vmem:[#allocation2 + $0x60] sm:$0xff]  }
 0x18c   :  { %v1714_v4 = vpop.permute.xlu0 %1713  ;;  %1610 = vmatprep.subr.bf16.mxu0 %v1737_v63 }
 0x18d   :  { %v1716_v53 = vunpack.i.h.bf16 %v1714_v4  ;;  %v1715_v55 = vunpack.i.l.bf16 %v1714_v4  ;;  %1611 = vmatpush3.bf16.msra.mxu0 %v1738_v0 }
 0x18e   :  { %1612 = vmatprep.subr.bf16.mxu0 %v1739_v32  ;;  %v1747_v32 = vld [vmem:[%s2418_s10 + $0x38] sm:$0xff]  }
 0x18f   :  { %v1065_v14 = vsel %vm508_vm4, %v1063_v12, %v1715_v55  ;;  %v1066_v18 = vsel %vm508_vm4, %v1064_v19, %v1716_v53  ;;  %v1568_v19 = vld [vmem:[%s2412_s4 + $0x1] ss:$0 sm:$0xff] }
 0x190   :  { %v1067_v37 = vpack.c.bf16 %v1066_v18, %v1065_v14 }
 0x191   :  { %1613 = vmatpush3.bf16.msra.mxu0 %v1740_v5  ;;  %v1748_v5 = vld [vmem:[%s2418_s10 + $0x30] sm:$0xff]  }
 0x192   :  { %1648 = vmatmul.mubr.msk.bf16.vlgmr.msra.gmra.mxu1 %vm529_vm5, %v1067_v37  ;;  %1614 = vmatprep.subr.bf16.mxu0 %v1741_v52  ;;  %v1749_v52 = vld [vmem:[%s2418_s10 + $0x28] sm:$0xff]  }
 0x193   :  { %1667 = vmatprep.mubr.msk.bf16.mxu1 %vm1843_vm1, %v1842_v61  ;;  %1652 = vmatpush3.bf16.msra.mxu1 %v1747_v32 }
 0x194   :  { %1653 = vmatprep.subr.bf16.mxu1 %v1842_v61 }
 0x195   :  { %1615 = vmatpush3.bf16.msra.mxu0 %v1742_v16  ;;  %v1750_v16 = vld [vmem:[%s2418_s10 + $0x20] sm:$0xff]  }
 0x196   :  { %1616 = vmatprep.subr.bf16.mxu0 %v1743_v58  ;;  %v1751_v58 = vld [vmem:[%s2418_s10 + $0x18] sm:$0xff]  }
 0x197   :  { %1654 = vmatpush3.bf16.msra.mxu1 %v1748_v5 }
 0x198   :  { %1655 = vmatprep.subr.bf16.mxu1 %v1842_v61 }
 0x199   :  { %1617 = vmatpush3.bf16.msra.mxu0 %v1744_v44  ;;  %v1752_v44 = vld [vmem:[%s2418_s10 + $0x10] sm:$0xff]  }
 0x19a   :  { %1618 = vmatprep.subr.bf16.mxu0 %v1745_v34  ;;  %v1753_v34 = vld [vmem:[%s2418_s10 + $0x8] sm:$0xff]  }
 0x19b   :  { %1656 = vmatpush3.bf16.msra.mxu1 %v1749_v52 }
 0x19c   :  { %1657 = vmatprep.subr.bf16.mxu1 %v1842_v61 }
 0x19d   :  { %1619 = vmatpush3.bf16.msra.mxu0 %v1746_v49  ;;  %v1754_v49 = vld [vmem:[%s2418_s10] sm:$0xff]  }
 0x19f   :  { %1658 = vmatpush3.bf16.msra.mxu1 %v1750_v16 }
 0x1a0   :  { %1659 = vmatprep.subr.bf16.mxu1 %v1842_v61 }
 0x1a3   :  { %1660 = vmatpush3.bf16.msra.mxu1 %v1751_v58 }
 0x1a4   :  { %1661 = vmatprep.subr.bf16.mxu1 %v1842_v61 }
 0x1a7   :  { %1662 = vmatpush3.bf16.msra.mxu1 %v1752_v44 }
 0x1a8   :  { %1663 = vmatprep.subr.bf16.mxu1 %v1842_v61 }
 0x1ab   :  { %1664 = vmatpush3.bf16.msra.mxu1 %v1753_v34 }
 0x1ac   :  { %1665 = vmatprep.subr.bf16.mxu1 %v1842_v61  ;;  %v1588_v61 = vld [vmem:[%s2417_s9] ss:$0 sm:$0xff] }
 0x1af   :  { %1666 = vmatpush3.bf16.msra.mxu1 %v1754_v49 }
 0x23b   :  { %v573_v22 = vpop.f32.mrf.mxu0 }
 0x23c   :  { %v574_v57 = vadd.f32 %v1539_v17, %v573_v22  ;;  %v1569_v22 = vld [vmem:[%s2413_s5 + $0x1] ss:$0 sm:$0xff] }
 0x23d   :  { %v1641_v25 = vpop.f32.mrf.mxu0 }
 0x23f   :  { %v576_v30 = vpop.f32.mrf.mxu0 }
 0x240   :  { %v577_v26 = vadd.f32 %v1539_v17, %v576_v30 }
 0x241   :  { %v1642_v13 = vpop.f32.mrf.mxu0 }
 0x242   :  { %v1543_v13 = vld [vmem:[%s2412_s4] ss:$0 sm:$0xff] }
 0x252   :  { %v1126_v54 = vpop.f32.mrf.mxu1 }
 0x253   :  { %v1127_v24 = vadd.f32 %v1564_v15, %v1126_v54 }
 0x254   :  { %v1649_v29 = vpop.f32.mrf.mxu1 }
 0x255   :  { %1135 = vadd.xlane.f32.xlu0 %v1127_v24  ;;  %v1544_v29 = vld [vmem:[%s2413_s5] ss:$0 sm:$0xff] }
 0x256   :  { %v1129_v45 = vpop.f32.mrf.mxu1 }
 0x257   :  { %v1130_v41 = vadd.f32 %v1564_v15, %v1129_v45 }
 0x258   :  { %v1650_v50 = vpop.f32.mrf.mxu1 }
 0x259   :  { %582 = vadd.xlane.f32.xlu0 %v574_v57  ;;  %1137 = vadd.xlane.f32.xlu1 %v1130_v41 }
 0x25d   :  { %584 = vadd.xlane.f32.xlu0 %v577_v26 }
 0x2de   :  { %v1136_v2 = vpop.xlane.xlu0 %1135 }
 0x2df   :  { %v1139_v3 = vmul.f32 0.0078125, %v1136_v2 }
 0x2e1   :  { %v2329_v47 = vsub.f32 %v1127_v24, %v1139_v3 }
 0x2e2   :  { %v583_v27 = vpop.xlane.xlu0 %582  ;;  %v1138_v1 = vpop.xlane.xlu1 %1137 }
 0x2e3   :  { %v587_v11 = vmul.f32 0.0078125, %v583_v27  ;;  %v1140_v38 = vmul.f32 0.0078125, %v1138_v1  ;;  %v1143_v36 = vmul.f32 %v2329_v47, %v2329_v47 }
 0x2e5   :  { %v2333_v31 = vsub.f32 %v574_v57, %v587_v11  ;;  %v2335_v39 = vsub.f32 %v1130_v41, %v1140_v38  ;;  %1145 = vadd.xlane.f32.xlu1 %v1143_v36 }
 0x2e6   :  { %v585_v56 = vpop.xlane.xlu0 %584 }
 0x2e7   :  { %v588_v21 = vmul.f32 0.0078125, %v585_v56  ;;  %v591_v28 = vmul.f32 %v2333_v31, %v2333_v31  ;;  %v1144_v33 = vmul.f32 %v2335_v39, %v2335_v39 }
 0x2e9   :  { %v2341_v48 = vsub.f32 %v577_v26, %v588_v21  ;;  %593 = vadd.xlane.f32.xlu1 %v591_v28  ;;  %1147 = vadd.xlane.f32.xlu0 %v1144_v33 }
 0x2eb   :  { %v592_v20 = vmul.f32 %v2341_v48, %v2341_v48 }
 0x2ed   :  { %595 = vadd.xlane.f32.xlu0 %v592_v20 }
 0x36e   :  { %v1146_v7 = vpop.xlane.xlu1 %1145 }
 0x36f   :  { %v1149_v8 = vmul.f32 0.0078125, %v1146_v7 }
 0x371   :  { %v1151_v9 = vadd.f32 1e-05, %v1149_v8 }
 0x372   :  { %v1148_v40 = vpop.xlane.xlu0 %1147  ;;  %v594_v10 = vpop.xlane.xlu1 %593 }
 0x373   :  { %1771 = vrsqrt.f32 %v1151_v9  ;;  %v1150_v43 = vmul.f32 0.0078125, %v1148_v40  ;;  %v597_v59 = vmul.f32 0.0078125, %v594_v10 }
 0x375   :  { %v1152_v6 = vadd.f32 1e-05, %v1150_v43  ;;  %v599_v51 = vadd.f32 1e-05, %v597_v59 }
 0x376   :  { %v596_v4 = vpop.xlane.xlu0 %595 }
 0x377   :  { %1773 = vrsqrt.f32 %v1152_v6  ;;  %v598_v53 = vmul.f32 0.0078125, %v596_v4  ;;  %v1587_v6 = vld [vmem:[%s2416_s8] ss:$0 sm:$0xff]  ;;  %s1845_s8 = smov [#allocation5]  }
 0x378   :  { %1775 = vrsqrt.f32 %v599_v51  ;;  %s1511_s19 = sshll.u32 %s1845_s8, 4  ;;  %s1512_s19 = int_to_ptr.vmem [resolvable:$true] %s1511_s19 }
 0x379   :  { %v600_v55 = vadd.f32 1e-05, %v598_v53  ;;  %s1805_s9 = scalar_lea.vmem %s1512_s19, 256  ;;  %p1810_p6 = scmp.lt.s32.totalorder %s1512_s19, %s1512_s19 }
 0x37a   :  { %p1806_p5 = scmp.ne.s32.totalorder %s1512_s19, %s1805_s9  ;;  %p1811_p7 = scmp.lt.s32.totalorder %s1805_s9, %s1805_s9 }
 0x37b   :  { %1777 = vrsqrt.f32 %v600_v55 }
 0x37c   :  { %p1812_p8 = por %p1811_p7, %p1810_p6 }
 0x37e   :  { %p1813_p9 = pnand %p1812_p8, %p1806_p5 }
 0x380   :  { %v1772_v12 = vpop.eup %1771 }
 0x381   :  { %v1155_v14 = vmul.f32 %v1772_v12, %v2329_v47 }
 0x383   :  { %v1161_v18 = vmul.f32 %v1568_v19, %v1155_v14 }
 0x384   :  { %v1774_v37 = vpop.eup %1773 }
 0x385   :  { %v1776_v25 = vpop.eup %1775  ;;  %v1156_v30 = vmul.f32 %v1774_v37, %v2335_v39  ;;  %v1167_v24 = vadd.f32 %v1569_v22, %v1161_v18  ;;  %v1570_v39 = vld [vmem:[%s2415_s7] ss:$0 sm:$0xff] }
 0x386   :  { %v603_v15 = vmul.f32 %v1776_v25, %v2333_v31  ;;  %v1589_v25 = vld [vmem:[%s2419_s11] ss:$0 sm:$0xff] }
 0x387   :  { %v1162_v54 = vmul.f32 %v1568_v19, %v1156_v30  ;;  %v1169_v50 = vmax.f32 %v1167_v24, 0.0 }
 0x388   :  { %v1778_v17 = vpop.eup %1777  ;;  %v609_v45 = vmul.f32 %v1543_v13, %v603_v15 }
 0x389   :  { %v1168_v57 = vadd.f32 %v1569_v22, %v1162_v54  ;;  %v604_v41 = vmul.f32 %v1778_v17, %v2341_v48 }
 0x38a   :  { %v615_v3 = vadd.f32 %v1544_v29, %v609_v45 }
 0x38b   :  { %v1170_v26 = vmax.f32 %v1168_v57, 0.0  ;;  %v610_v2 = vmul.f32 %v1543_v13, %v604_v41 }
 0x38c   :  { %v617_v1 = vmax.f32 %v615_v3, 0.0 }
 0x38d   :  { %v1172_v47 = vpack.c.bf16 %v1170_v26, %v1169_v50  ;;  %v616_v27 = vadd.f32 %v1544_v29, %v610_v2 }
 0x38f   :  { %1340 = vmatprep.mubr.bf16.mxu0 %v1172_v47  ;;  %v618_v11 = vmax.f32 %v616_v27, 0.0 }
 0x391   :  { %v1171_v38 = vpack.c.bf16 %v618_v11, %v617_v1 }
 0x393   :  { %1341 = vmatmul.mubr.bf16.vlgmr.msra.gmra.mxu0 %v1171_v38 }
 0x453   :  { %v1620_v36 = vpop.f32.mrf.mxu0 }
 0x455   :  { %v1621_v31 = vpop.f32.mrf.mxu0 }
 0x456   :  { %v1622_v56 = vadd.f32 %v1621_v31, %v1620_v36 }
 0x457   :  { %v1623_v21 = vpop.f32.mrf.mxu0 }
 0x458   :  { %v1343_v28 = vadd.f32 %v1622_v56, %v1570_v39 }
 0x459   :  { %v1624_v33 = vpop.f32.mrf.mxu0 }
 0x45a   :  { %v1625_v48 = vadd.f32 %v1624_v33, %v1623_v21  ;;  %1351 = vadd.xlane.f32.xlu1 %v1343_v28 }
 0x45c   :  { %v1346_v20 = vadd.f32 %v1625_v48, %v1570_v39 }
 0x45e   :  { %1353 = vadd.xlane.f32.xlu0 %v1346_v20 }
 0x4e3   :  { %v1352_v23 = vpop.xlane.xlu1 %1351 }
 0x4e4   :  { %v1355_v42 = vmul.f32 0.0078125, %v1352_v23 }
 0x4e6   :  { %v1357_v46 = vsub.f32 %v1343_v28, %v1355_v42 }
 0x4e7   :  { %v1354_v35 = vpop.xlane.xlu0 %1353 }
 0x4e8   :  { %v1356_v60 = vmul.f32 0.0078125, %v1354_v35  ;;  %v1359_v62 = vmul.f32 %v1357_v46, %v1357_v46 }
 0x4ea   :  { %v1358_v63 = vsub.f32 %v1346_v20, %v1356_v60  ;;  %1361 = vadd.xlane.f32.xlu1 %v1359_v62 }
 0x4ec   :  { %v1360_v0 = vmul.f32 %v1358_v63, %v1358_v63 }
 0x4ee   :  { %1363 = vadd.xlane.f32.xlu0 %v1360_v0 }
 0x573   :  { %v1362_v7 = vpop.xlane.xlu1 %1361 }
 0x574   :  { %v1365_v8 = vmul.f32 0.0078125, %v1362_v7 }
 0x576   :  { %v1367_v9 = vadd.f32 1e-05, %v1365_v8 }
 0x577   :  { %v1364_v40 = vpop.xlane.xlu0 %1363 }
 0x578   :  { %1779 = vrsqrt.f32 %v1367_v9  ;;  %v1366_v10 = vmul.f32 0.0078125, %v1364_v40 }
 0x57a   :  { %v1368_v43 = vadd.f32 1e-05, %v1366_v10 }
 0x57c   :  { %1781 = vrsqrt.f32 %v1368_v43 }
 0x585   :  { %v1780_v59 = vpop.eup %1779 }
 0x586   :  { %v1371_v51 = vmul.f32 %v1780_v59, %v1357_v46 }
 0x588   :  { %v1379_v4 = vmul.f32 %v1587_v6, %v1371_v51 }
 0x589   :  { %v1782_v53 = vpop.eup %1781 }
 0x58a   :  { %v1372_v55 = vmul.f32 %v1782_v53, %v1358_v63  ;;  %v1387_v19 = vadd.f32 %v1588_v61, %v1379_v4 }
 0x58c   :  { %v1380_v12 = vmul.f32 %v1587_v6, %v1372_v55  ;;  %v1389_v18 = vmax.f32 %v1387_v19, 0.0 }
 0x58e   :  { %v1388_v14 = vadd.f32 %v1588_v61, %v1380_v12 }
 0x590   :  { %v1390_v37 = vmax.f32 %v1388_v14, 0.0 }
 0x592   :  { %v1391_v22 = vpack.c.bf16 %v1390_v37, %v1389_v18 }
 0x594   :  { %1668 = vmatmul.mubr.bf16.vlgmr.msra.gmra.mxu1 %v1391_v22 }
 0x654   :  { %v1497_v30 = vpop.f32.mrf.mxu1 }
 0x655   :  { %v1498_v13 = vadd.f32 %v1589_v25, %v1497_v30 }
 0x656   :  { %v1669_v15 = vpop.f32.mrf.mxu1 }
 0x657   :  { %1504 = vst [vmem:[#allocation5] sm:$0xff] %v1498_v13 }
 0x658   :  { %v1500_v54 = vpop.f32.mrf.mxu1 }
 0x659   :  { %v1501_v24 = vadd.f32 %v1589_v25, %v1500_v54 }
 0x65a   :  { %v1670_v17 = vpop.f32.mrf.mxu1 }
 0x65b   :  { %1505 = vst [vmem:[#allocation5 + $0x8] sm:$0xff] %v1501_v24 }
 0x65c   :  { %1816 = shalt.err (!%p1813_p9)
}
 0x65d   :  { %s1846_s20 = smov 128  }
 0x65e   :  { %1517 = dma.vmem_to_hbm [thread:$0]  %s1512_s19, 256, %s2420_s12, [#allocation4], %s1846_s20, %s1846_s20, %s1840_s1  }
 0x65f   :  { %1827 = dma.done.wait [#allocation4], 256  }
 0x660   :  { %1828 = vsyncadd [#allocation4], 4294967040 }
 0x661   :  { %1521 = vsyncpa [#allocation3], 1 }
 0x662   :  { %1522 = vsyncpa [#allocation4], 1 }

</bundles_post_ra>
